<compile_context>
chip_gen: v7x
topology: tpu7x:2x2x1
jax: 0.10.0
libtpu: 0.0.40
codegen_flags: <defaults>
</compile_context>

<pallas_src>
import jax
import jax.numpy as jnp
from jax.experimental import pallas as pl
from jax.experimental.pallas import tpu as pltpu


def add_layernorm_kernel(x_ref, y_ref, gb_ref, o_ref):
    # fused: s = x + y ; LayerNorm(s) over last dim (eps=1e-5, affine)
    s = x_ref[...].astype(jnp.float32) + y_ref[...].astype(jnp.float32)
    c = s.shape[-1]
    inv_c = 1.0 / c
    mean = jnp.sum(s, axis=-1, keepdims=True) * inv_c          # (rows, 1)
    centered = s - mean
    var = jnp.sum(centered * centered, axis=-1, keepdims=True) * inv_c
    inv = jax.lax.rsqrt(var + 1e-5)                            # EUP, ~free
    gamma = gb_ref[0:1, :].astype(jnp.float32)                 # (1, C)
    beta = gb_ref[1:2, :].astype(jnp.float32)                  # (1, C)
    o_ref[...] = (centered * inv * gamma + beta).astype(o_ref.dtype)


def _dimension_semantics(n_steps):
    """CORE_PARALLEL on v7x (2 TCs) so both cores get a tile; 'parallel' else."""
    if n_steps < 2:
        return ("arbitrary",)
    try:
        kind = jax.devices()[0].device_kind.lower()
    except Exception:
        kind = ""
    if "v7" in kind and hasattr(pltpu, "CORE_PARALLEL"):
        return (pltpu.CORE_PARALLEL,)
    return ("parallel",)


def add_layernorm(x80, x94, gamma, beta):
    # x80, x94: [..., C]; gamma, beta: [C]
    orig_shape = x80.shape
    C = orig_shape[-1]
    R = 1
    for s in orig_shape[:-1]:
        R *= int(s)

    x2d = x80.reshape(R, C)
    y2d = x94.reshape(R, C)
    gb = jnp.stack([gamma, beta], axis=0)             # (2, C) packed affine params

    # 2-step grid when it tiles cleanly (tile rows must be a multiple of 8
    # unless equal to the full extent); otherwise one full-size tile.
    n_steps = 2
    if R % n_steps != 0 or (R // n_steps) % 8 != 0:
        n_steps = 1
    tile_rows = R // n_steps
    grid = (n_steps,)

    itemsize = jnp.dtype(x2d.dtype).itemsize
    cost = pl.CostEstimate(
        flops=9 * R * C,                  # add, sub, 2 reductions, scale/shift
        transcendentals=R,                # one rsqrt per row
        bytes_accessed=3 * R * C * itemsize + 2 * C * 4,
    )

    out2d = pl.pallas_call(
        add_layernorm_kernel,
        out_shape=jax.ShapeDtypeStruct((R, C), x80.dtype),
        grid_spec=pl.GridSpec(
            grid=grid,
            in_specs=[
                pl.BlockSpec((tile_rows, C), lambda i: (i, 0)),
                pl.BlockSpec((tile_rows, C), lambda i: (i, 0)),
                pl.BlockSpec((2, C), lambda i: (0, 0)),
            ],
            out_specs=pl.BlockSpec((tile_rows, C), lambda i: (i, 0)),
        ),
        compiler_params=pltpu.CompilerParams(
            dimension_semantics=_dimension_semantics(n_steps),
        ),
        cost_estimate=cost,
    )(x2d, y2d, gb)

    return out2d.reshape(orig_shape)


if __name__ == "__main__":
    key = jax.random.PRNGKey(0)
    k1, k2 = jax.random.split(key)

    # Shapes implied by the module's forward: [1, 28, 28, 192]
    N, H, W, C = 1, 28, 28, 192
    x80 = jax.random.normal(k1, (N, H, W, C), dtype=jnp.float32)
    x94 = jax.random.normal(k2, (N, H, W, C), dtype=jnp.float32)

    # LayerNorm(192, elementwise_affine=True) default init: weight=1, bias=0
    gamma = jnp.ones((C,), dtype=jnp.float32)
    beta = jnp.zeros((C,), dtype=jnp.float32)

    out = add_layernorm(x80, x94, gamma, beta)
    out = jax.block_until_ready(out)

    # Pure-JAX reference check (two-pass LayerNorm, PyTorch semantics)
    s = x80 + x94
    mean = jnp.mean(s, axis=-1, keepdims=True)
    var = jnp.mean((s - mean) ** 2, axis=-1, keepdims=True)
    ref = (s - mean) * jax.lax.rsqrt(var + 1e-5) * gamma + beta
    assert jnp.allclose(out, ref, atol=2e-5, rtol=2e-5), "mismatch vs reference"

    print("KERNEL_OK")
</pallas_src>

<mosaic_0001>
module attributes {stable_mosaic.version = 11 : i64} {
  func.func @add_layernorm_kernel(%arg0: i32, %arg1: memref<392x192xf32, #tpu.memory_space<vmem>>, %arg2: memref<392x192xf32, #tpu.memory_space<vmem>>, %arg3: memref<2x192xf32, #tpu.memory_space<vmem>>, %arg4: memref<392x192xf32, #tpu.memory_space<vmem>>) attributes {dimension_semantics = [#tpu.dimension_semantics<parallel>], iteration_bounds = array<i64: 2>, scalar_prefetch = 0 : i64, scratch_operands = 0 : i64, tpu.core_type = #tpu.core_type<tc>, window_params = [{transform_indices = @transform_0, window_bounds = array<i64: 392, 192>}, {transform_indices = @transform_1, window_bounds = array<i64: 392, 192>}, {pipeline_mode = #tpu.pipeline_mode<synchronous>, transform_indices = @transform_2, window_bounds = array<i64: 2, 192>}, {transform_indices = @transform_3, window_bounds = array<i64: 392, 192>}]} {
    %c0 = arith.constant 0 : index
    %c0_0 = arith.constant 0 : index
    %0 = vector.load %arg1[%c0, %c0_0] : memref<392x192xf32, #tpu.memory_space<vmem>>, vector<392x192xf32>
    %c0_1 = arith.constant 0 : index
    %c0_2 = arith.constant 0 : index
    %1 = vector.load %arg2[%c0_1, %c0_2] : memref<392x192xf32, #tpu.memory_space<vmem>>, vector<392x192xf32>
    %2 = arith.addf %0, %1 : vector<392x192xf32>
    %cst = arith.constant dense<0.000000e+00> : vector<392xf32>
    %3 = vector.multi_reduction <add>, %2, %cst [1] : vector<392x192xf32> to vector<392xf32>
    %4 = vector.shape_cast %3 : vector<392xf32> to vector<392x1xf32>
    %cst_3 = arith.constant 0.00520833349 : f32
    %5 = vector.broadcast %cst_3 : f32 to vector<392x1xf32>
    %6 = arith.mulf %4, %5 : vector<392x1xf32>
    %7 = vector.broadcast %6 : vector<392x1xf32> to vector<392x192xf32>
    %8 = arith.subf %2, %7 : vector<392x192xf32>
    %9 = arith.mulf %8, %8 : vector<392x192xf32>
    %cst_4 = arith.constant dense<0.000000e+00> : vector<392xf32>
    %10 = vector.multi_reduction <add>, %9, %cst_4 [1] : vector<392x192xf32> to vector<392xf32>
    %11 = vector.shape_cast %10 : vector<392xf32> to vector<392x1xf32>
    %cst_5 = arith.constant 0.00520833349 : f32
    %12 = vector.broadcast %cst_5 : f32 to vector<392x1xf32>
    %13 = arith.mulf %11, %12 : vector<392x1xf32>
    %cst_6 = arith.constant 9.99999974E-6 : f32
    %14 = vector.broadcast %cst_6 : f32 to vector<392x1xf32>
    %15 = arith.addf %13, %14 : vector<392x1xf32>
    %16 = math.rsqrt %15 : vector<392x1xf32>
    %c0_7 = arith.constant 0 : index
    %c0_8 = arith.constant 0 : index
    %17 = vector.load %arg3[%c0_7, %c0_8] : memref<2x192xf32, #tpu.memory_space<vmem>>, vector<1x192xf32>
    %c1 = arith.constant 1 : index
    %c0_9 = arith.constant 0 : index
    %18 = vector.load %arg3[%c1, %c0_9] : memref<2x192xf32, #tpu.memory_space<vmem>>, vector<1x192xf32>
    %19 = vector.broadcast %16 : vector<392x1xf32> to vector<392x192xf32>
    %20 = arith.mulf %8, %19 : vector<392x192xf32>
    %21 = vector.broadcast %17 : vector<1x192xf32> to vector<392x192xf32>
    %22 = arith.mulf %20, %21 : vector<392x192xf32>
    %23 = vector.broadcast %18 : vector<1x192xf32> to vector<392x192xf32>
    %24 = arith.addf %22, %23 : vector<392x192xf32>
    %c0_10 = arith.constant 0 : index
    %c0_11 = arith.constant 0 : index
    %25 = vector.load %arg4[%c0_10, %c0_11] : memref<392x192xf32, #tpu.memory_space<vmem>>, vector<392x192xf32>
    tpu.vector_store %arg4[%c0_10, %c0_11], %24 {strides = array<i32>} : memref<392x192xf32, #tpu.memory_space<vmem>>, vector<392x192xf32>,
    return
  }
  func.func @transform_0(%arg0: i32) -> (i32, i32) {
    %c0_i32 = arith.constant 0 : i32
    %c0_i32_0 = arith.constant 0 : i32
    return %arg0, %c0_i32 : i32, i32
  }
  func.func @transform_1(%arg0: i32) -> (i32, i32) {
    %c0_i32 = arith.constant 0 : i32
    %c0_i32_0 = arith.constant 0 : i32
    return %arg0, %c0_i32 : i32, i32
  }
  func.func @transform_2(%arg0: i32) -> (i32, i32) {
    %c0_i32 = arith.constant 0 : i32
    %c0_i32_0 = arith.constant 0 : i32
    %c0_i32_1 = arith.constant 0 : i32
    return %c0_i32, %c0_i32_0 : i32, i32
  }
  func.func @transform_3(%arg0: i32) -> (i32, i32) {
    %c0_i32 = arith.constant 0 : i32
    %c0_i32_0 = arith.constant 0 : i32
    return %arg0, %c0_i32 : i32, i32
  }
}

</mosaic_0001>

<bundles_post_ra>
// kernel: tpu_custom_call.1
= control target key start
LH: loop header
LB: loop body
LE: loop exit
PB: predicated region body
PF: predicated region fallthrough
CT: control target
= control target key end

     0   :  { %s1921_s12 = smov 0   ;;  %s3521_s0 = inlined_call_operand.vmem [shape: f32[784,192], index: 0, kind: input, shape index: {}]   ;;  %s3522_s1 = inlined_call_operand.vmem [shape: f32[784,192], index: 1, kind: input, shape index: {}]   ;;  %s3523_s2 = inlined_call_operand.vmem [shape: f32[2,192], index: 2, kind: input, shape index: {}]   ;;  %s3524_s3 = inlined_call_operand.vmem [shape: f32[784,192], index: 3, kind: output, shape index: {}]  }
   0x1 LB: > { %s1770_s13 = sadd.s32 4294967295, %s1899_s12   ;;  %p1774_p0 = scmp.ge.s32.totalorder %s1899_s12, 1  ;;  %s1899_s12 = sphi %s1921_s12, %s13_s12  }
   0x2   : > { %p151_p1 = scmp.lt.s32.totalorder %s1899_s12, 3 }
   0x4   : > { %p152_p2 = pnand %p1774_p0, %p151_p1 }
   0x6   : > { %155 = sbr.rel (%p152_p2) target bundleno = 452 (0x1c4), region = 32 }
   0xd   : > { %s183_s14 = smul.u32 49, %s1770_s13  ;;  %vm498_vm0 = vcmask 523264  }
   0xf   : > { %p184_p3 = scmp.lt.s32.totalorder %s183_s14, 97 }
  0x11   : > { %s3838_s14 = smov (!%p184_p3, %s183_s14), 97 }
  0x12   : > { %s1929_s15 = sshll.u32 %s3838_s14, 4 }
  0x13   : > { %s1935_s18 = scalar_lea.vmem %s3521_s0, %s1929_s15  ;;  %s1941_s21 = scalar_lea.vmem %s3522_s1, %s1929_s15 }
  0x14   : > { %v204_v0 = vld [vmem:[%s1935_s18] sm:$0xff]  ;;  %v205_v1 = vld [vmem:[%s1935_s18 + $0x8] sm:$0xff]  ;;  %v206_v10 = vld [vmem:[%s1935_s18 + $0x10] sm:$0xff]  ;;  %s3043_s28 = scalar_lea.vmem %s3524_s3, %s1929_s15 }
  0x15   : > { %v302_v2 = vld [vmem:[%s1941_s21] sm:$0xff]  ;;  %v303_v3 = vld [vmem:[%s1941_s21 + $0x8] sm:$0xff]  ;;  %v207_v13 = vld [vmem:[%s1935_s18 + $0x18] sm:$0xff] }
  0x16   : > { %v1947_v4 = vadd.f32 %v302_v2, %v204_v0  ;;  %v208_v5 = vld [vmem:[%s1935_s18 + $0x20] sm:$0xff]  ;;  %v209_v6 = vld [vmem:[%s1935_s18 + $0x28] sm:$0xff]  ;;  %v1951_v7 = vadd.f32 %v303_v3, %v205_v1  ;;  %v304_v14 = vld [vmem:[%s1941_s21 + $0x10] sm:$0xff] }
  0x17   : > { %v306_v8 = vld [vmem:[%s1941_s21 + $0x20] sm:$0xff]  ;;  %v307_v9 = vld [vmem:[%s1941_s21 + $0x28] sm:$0xff]  ;;  %v305_v15 = vld [vmem:[%s1941_s21 + $0x18] sm:$0xff]  ;;  %v1965_v17 = vadd.f32 %v304_v14, %v206_v10 }
  0x18   : > { %v1956_v11 = vadd.f32 %v306_v8, %v208_v5  ;;  %v1958_v12 = vadd.f32 %v307_v9, %v209_v6  ;;  %v499_v16 = vsel %vm498_vm0, %v1951_v7, 0.0  ;;  %v1967_v18 = vadd.f32 %v305_v15, %v207_v13  ;;  %v210_v19 = vld [vmem:[%s1935_s18 + $0x30] sm:$0xff]  ;;  %v211_v20 = vld [vmem:[%s1935_s18 + $0x38] sm:$0xff]  ;;  %v212_v26 = vld [vmem:[%s1935_s18 + $0x40] sm:$0xff] }
  0x19   : > { %v308_v21 = vld [vmem:[%s1941_s21 + $0x30] sm:$0xff]  ;;  %v500_v22 = vadd.f32 %v499_v16, %v1947_v4  ;;  %v309_v24 = vld [vmem:[%s1941_s21 + $0x38] sm:$0xff]  ;;  %v213_v27 = vld [vmem:[%s1935_s18 + $0x48] sm:$0xff] }
  0x1a   : > { %v507_v23 = vsel %vm498_vm0, %v1958_v12, 0.0  ;;  %v1976_v25 = vadd.f32 %v308_v21, %v210_v19  ;;  %v503_v29 = vsel %vm498_vm0, %v1967_v18, 0.0  ;;  %v1983_v30 = vadd.f32 %v309_v24, %v211_v20  ;;  %v310_v31 = vld [vmem:[%s1941_s21 + $0x40] sm:$0xff]  ;;  %v311_v32 = vld [vmem:[%s1941_s21 + $0x48] sm:$0xff]  ;;  %v214_v33 = vld [vmem:[%s1935_s18 + $0x50] sm:$0xff] }
  0x1b   : > { %v508_v28 = vadd.f32 %v507_v23, %v1956_v11  ;;  %501 = vadd.xlane.f32.xlu0 %v500_v22  ;;  %v504_v34 = vadd.f32 %v503_v29, %v1965_v17  ;;  %v1989_v35 = vadd.f32 %v310_v31, %v212_v26  ;;  %v1991_v36 = vadd.f32 %v311_v32, %v213_v27  ;;  %v215_v37 = vld [vmem:[%s1935_s18 + $0x58] sm:$0xff]  ;;  %v312_v38 = vld [vmem:[%s1941_s21 + $0x50] sm:$0xff]  ;;  %v216_v43 = vld [vmem:[%s1935_s18 + $0x60] sm:$0xff] }
  0x1c   : > { %v313_v39 = vld [vmem:[%s1941_s21 + $0x58] sm:$0xff]  ;;  %v511_v40 = vsel %vm498_vm0, %v1983_v30, 0.0  ;;  %v1998_v41 = vadd.f32 %v312_v38, %v214_v33  ;;  %v217_v44 = vld [vmem:[%s1935_s18 + $0x68] sm:$0xff]  ;;  %v314_v45 = vld [vmem:[%s1941_s21 + $0x60] sm:$0xff] }
  0x1d   : > { %509 = vadd.xlane.f32.xlu1 %v508_v28  ;;  %v2000_v42 = vadd.f32 %v313_v39, %v215_v37  ;;  %v512_v46 = vadd.f32 %v511_v40, %v1976_v25  ;;  %v515_v47 = vsel %vm498_vm0, %v1991_v36, 0.0  ;;  %v315_v48 = vld [vmem:[%s1941_s21 + $0x68] sm:$0xff]  ;;  %v218_v49 = vld [vmem:[%s1935_s18 + $0x70] sm:$0xff]  ;;  %v219_v50 = vld [vmem:[%s1935_s18 + $0x78] sm:$0xff]  ;;  %v2018_v56 = vadd.f32 %v314_v45, %v216_v43 }
  0x1e   : > { %v2013_v52 = vadd.f32 %v315_v48, %v217_v44  ;;  %v316_v53 = vld [vmem:[%s1941_s21 + $0x70] sm:$0xff]  ;;  %v317_v54 = vld [vmem:[%s1941_s21 + $0x78] sm:$0xff]  ;;  %v516_v55 = vadd.f32 %v515_v47, %v1989_v35  ;;  %v220_v58 = vld [vmem:[%s1935_s18 + $0x80] sm:$0xff] }
  0x1f   : > { %v519_v51 = vsel %vm498_vm0, %v2000_v42, 0.0  ;;  %505 = vadd.xlane.f32.xlu0 %v504_v34  ;;  %v2020_v57 = vadd.f32 %v317_v54, %v219_v50  ;;  %v221_v59 = vld [vmem:[%s1935_s18 + $0x88] sm:$0xff]  ;;  %v2028_v63 = vadd.f32 %v316_v53, %v218_v49  ;;  %v318_v0 = vld [vmem:[%s1941_s21 + $0x80] sm:$0xff]  ;;  %v222_v2 = vld [vmem:[%s1935_s18 + $0x90] sm:$0xff] }
  0x20   : > { %v319_v60 = vld [vmem:[%s1941_s21 + $0x88] sm:$0xff]  ;;  %v520_v61 = vadd.f32 %v519_v51, %v1998_v41  ;;  %v523_v62 = vsel %vm498_vm0, %v2013_v52, 0.0  ;;  %v223_v3 = vld [vmem:[%s1935_s18 + $0x98] sm:$0xff]  ;;  %v320_v6 = vld [vmem:[%s1941_s21 + $0x90] sm:$0xff]  ;;  %v2044_v15 = vadd.f32 %v318_v0, %v220_v58 }
  0x21   : > { %513 = vadd.xlane.f32.xlu1 %v512_v46  ;;  %v2031_v1 = vadd.f32 %v319_v60, %v221_v59  ;;  %v527_v5 = vsel %vm498_vm0, %v2020_v57, 0.0  ;;  %v321_v8 = vld [vmem:[%s1941_s21 + $0x98] sm:$0xff]  ;;  %v225_v9 = vld [vmem:[%s1935_s18 + $0xa8] sm:$0xff]  ;;  %v524_v14 = vadd.f32 %v523_v62, %v2018_v56  ;;  %v2051_v22 = vadd.f32 %v320_v6, %v222_v2  ;;  %v224_v23 = vld [vmem:[%s1935_s18 + $0xa0] sm:$0xff] }
  0x22   : > { %v2040_v10 = vadd.f32 %v321_v8, %v223_v3  ;;  %v323_v13 = vld [vmem:[%s1941_s21 + $0xa8] sm:$0xff]  ;;  %v227_v16 = vld [vmem:[%s1935_s18 + $0xb8] sm:$0xff]  ;;  %v528_v20 = vadd.f32 %v527_v5, %v2028_v63  ;;  %v322_v24 = vld [vmem:[%s1941_s21 + $0xa0] sm:$0xff] }
  0x23   : > { %517 = vadd.xlane.f32.xlu0 %v516_v55  ;;  %v325_v19 = vld [vmem:[%s1941_s21 + $0xb8] sm:$0xff]  ;;  %v531_v21 = vsel %vm498_vm0, %v2031_v1, 0.0  ;;  %v2055_v26 = vadd.f32 %v323_v13, %v225_v9  ;;  %v226_v27 = vld [vmem:[%s1935_s18 + $0xb0] sm:$0xff]  ;;  %v229_v32 = vld [vmem:[%s1935_s18 + $0xc8] sm:$0xff]  ;;  %v2068_v39 = vadd.f32 %v322_v24, %v224_v23 }
  0x24   : > { %v535_v28 = vsel %vm498_vm0, %v2040_v10, 0.0  ;;  %v324_v29 = vld [vmem:[%s1941_s21 + $0xb0] sm:$0xff]  ;;  %v2061_v31 = vadd.f32 %v325_v19, %v227_v16  ;;  %v327_v33 = vld [vmem:[%s1941_s21 + $0xc8] sm:$0xff]  ;;  %v231_v34 = vld [vmem:[%s1935_s18 + $0xd8] sm:$0xff]  ;;  %v532_v38 = vadd.f32 %v531_v21, %v2044_v15 }
  0x25   : > { %521 = vadd.xlane.f32.xlu1 %v520_v61  ;;  %v329_v37 = vld [vmem:[%s1941_s21 + $0xd8] sm:$0xff]  ;;  %v536_v40 = vadd.f32 %v535_v28, %v2051_v22  ;;  %v539_v43 = vsel %vm498_vm0, %v2055_v26, 0.0  ;;  %v2073_v44 = vadd.f32 %v324_v29, %v226_v27  ;;  %v228_v45 = vld [vmem:[%s1935_s18 + $0xc0] sm:$0xff]  ;;  %v2077_v47 = vadd.f32 %v327_v33, %v229_v32  ;;  %v230_v48 = vld [vmem:[%s1935_s18 + $0xd0] sm:$0xff] }
  0x26   : > { %v326_v46 = vld [vmem:[%s1941_s21 + $0xc0] sm:$0xff]  ;;  %v543_v49 = vsel %vm498_vm0, %v2061_v31, 0.0  ;;  %v328_v50 = vld [vmem:[%s1941_s21 + $0xd0] sm:$0xff]  ;;  %v2083_v51 = vadd.f32 %v329_v37, %v231_v34  ;;  %v233_v53 = vld [vmem:[%s1935_s18 + $0xe8] sm:$0xff]  ;;  %v540_v59 = vadd.f32 %v539_v43, %v2068_v39 }
  0x27   : > { %525 = vadd.xlane.f32.xlu0 %v524_v14  ;;  %v331_v54 = vld [vmem:[%s1941_s21 + $0xe8] sm:$0xff]  ;;  %v235_v55 = vld [vmem:[%s1935_s18 + $0xf8] sm:$0xff]  ;;  %v2090_v60 = vadd.f32 %v326_v46, %v228_v45  ;;  %v544_v61 = vadd.f32 %v543_v49, %v2073_v44  ;;  %v547_v62 = vsel %vm498_vm0, %v2077_v47, 0.0  ;;  %v2095_v0 = vadd.f32 %v328_v50, %v230_v48  ;;  %v232_v2 = vld [vmem:[%s1935_s18 + $0xe0] sm:$0xff] }
  0x28   : > { %v333_v58 = vld [vmem:[%s1941_s21 + $0xf8] sm:$0xff]  ;;  %v330_v3 = vld [vmem:[%s1941_s21 + $0xe0] sm:$0xff]  ;;  %v2099_v5 = vadd.f32 %v331_v54, %v233_v53  ;;  %v234_v6 = vld [vmem:[%s1935_s18 + $0xf0] sm:$0xff]  ;;  %v551_v8 = vsel %vm498_vm0, %v2083_v51, 0.0 }
  0x29   : > { %529 = vadd.xlane.f32.xlu1 %v528_v20  ;;  %v332_v9 = vld [vmem:[%s1941_s21 + $0xf0] sm:$0xff]  ;;  %v2105_v13 = vadd.f32 %v333_v58, %v235_v55  ;;  %v237_v14 = vld [vmem:[%s1935_s18 + $0x108] sm:$0xff]  ;;  %v239_v19 = vld [vmem:[%s1935_s18 + $0x118] sm:$0xff]  ;;  %v548_v21 = vadd.f32 %v547_v62, %v2090_v60  ;;  %v2112_v23 = vadd.f32 %v330_v3, %v232_v2  ;;  %v552_v24 = vadd.f32 %v551_v8, %v2095_v0 }
  0x2a   : > { %v335_v16 = vld [vmem:[%s1941_s21 + $0x108] sm:$0xff]  ;;  %v337_v20 = vld [vmem:[%s1941_s21 + $0x118] sm:$0xff]  ;;  %v555_v27 = vsel %vm498_vm0, %v2099_v5, 0.0  ;;  %v2117_v28 = vadd.f32 %v332_v9, %v234_v6  ;;  %v236_v29 = vld [vmem:[%s1935_s18 + $0x100] sm:$0xff] }
  0x2b   : > { %533 = vadd.xlane.f32.xlu0 %v532_v38  ;;  %v334_v32 = vld [vmem:[%s1941_s21 + $0x100] sm:$0xff]  ;;  %v2121_v33 = vadd.f32 %v335_v16, %v237_v14  ;;  %v238_v34 = vld [vmem:[%s1935_s18 + $0x110] sm:$0xff]  ;;  %v559_v37 = vsel %vm498_vm0, %v2105_v13, 0.0  ;;  %v241_v43 = vld [vmem:[%s1935_s18 + $0x128] sm:$0xff]  ;;  %v556_v49 = vadd.f32 %v555_v27, %v2112_v23 }
  0x2c   : > { %v336_v38 = vld [vmem:[%s1941_s21 + $0x110] sm:$0xff]  ;;  %v339_v45 = vld [vmem:[%s1941_s21 + $0x128] sm:$0xff]  ;;  %v243_v46 = vld [vmem:[%s1935_s18 + $0x138] sm:$0xff]  ;;  %v2134_v50 = vadd.f32 %v334_v32, %v236_v29  ;;  %v560_v53 = vadd.f32 %v559_v37, %v2117_v28 }
  0x2d   : > { %537 = vadd.xlane.f32.xlu1 %v536_v40  ;;  %v2127_v40 = vadd.f32 %v337_v20, %v239_v19  ;;  %v341_v48 = vld [vmem:[%s1941_s21 + $0x138] sm:$0xff]  ;;  %v563_v54 = vsel %vm498_vm0, %v2121_v33, 0.0  ;;  %v2139_v55 = vadd.f32 %v336_v38, %v238_v34  ;;  %v240_v58 = vld [vmem:[%s1935_s18 + $0x120] sm:$0xff]  ;;  %v242_v62 = vld [vmem:[%s1935_s18 + $0x130] sm:$0xff] }
  0x2e   : > { %v340_v3 = vld [vmem:[%s1941_s21 + $0x130] sm:$0xff]  ;;  %v2149_v6 = vadd.f32 %v341_v48, %v243_v46  ;;  %v245_v8 = vld [vmem:[%s1935_s18 + $0x148] sm:$0xff]  ;;  %v247_v14 = vld [vmem:[%s1935_s18 + $0x158] sm:$0xff]  ;;  %v564_v19 = vadd.f32 %v563_v54, %v2134_v50 }
  0x2f   : > { %541 = vadd.xlane.f32.xlu0 %v540_v59  ;;  %v338_v59 = vld [vmem:[%s1941_s21 + $0x120] sm:$0xff]  ;;  %v567_v2 = vsel %vm498_vm0, %v2127_v40, 0.0  ;;  %v343_v9 = vld [vmem:[%s1941_s21 + $0x148] sm:$0xff]  ;;  %v345_v16 = vld [vmem:[%s1941_s21 + $0x158] sm:$0xff]  ;;  %v2161_v27 = vadd.f32 %v340_v3, %v242_v62 }
  0x30   : > { %3629 = vst [vmem:[#allocation2_spill] sm:$0xff] %v2149_v6  ;;  %v2156_v20 = vadd.f32 %v338_v59, %v240_v58  ;;  %v244_v29 = vld [vmem:[%s1935_s18 + $0x140] sm:$0xff]  ;;  %v2165_v34 = vadd.f32 %v343_v9, %v245_v8  ;;  %v246_v37 = vld [vmem:[%s1935_s18 + $0x150] sm:$0xff]  ;;  %v575_v38 = vsel %vm498_vm0, %v2149_v6, 0.0  ;;  %v249_v46 = vld [vmem:[%s1935_s18 + $0x168] sm:$0xff] }
  0x31   : > { %545 = vadd.xlane.f32.xlu1 %v544_v61  ;;  %v2143_v61 = vadd.f32 %v339_v45, %v241_v43  ;;  %v342_v32 = vld [vmem:[%s1941_s21 + $0x140] sm:$0xff]  ;;  %v344_v43 = vld [vmem:[%s1941_s21 + $0x150] sm:$0xff]  ;;  %v2171_v45 = vadd.f32 %v345_v16, %v247_v14  ;;  %v347_v48 = vld [vmem:[%s1941_s21 + $0x168] sm:$0xff]  ;;  %v576_v59 = vadd.f32 %v575_v38, %v2161_v27 }
  0x32   : > { %3630 = vst [vmem:[#allocation3_spill] sm:$0xff] %v2165_v34  ;;  %v2178_v58 = vadd.f32 %v342_v32, %v244_v29  ;;  %v579_v62 = vsel %vm498_vm0, %v2165_v34, 0.0  ;;  %v248_v3 = vld [vmem:[%s1935_s18 + $0x160] sm:$0xff]  ;;  %v2187_v9 = vadd.f32 %v347_v48, %v249_v46  ;;  %v250_v14 = vld [vmem:[%s1935_s18 + $0x170] sm:$0xff]  ;;  %v351_v29 = vld [vmem:[%s1941_s21 + $0x188] sm:$0xff] }
  0x33   : > { %549 = vadd.xlane.f32.xlu0 %v548_v21  ;;  %v568_v21 = vadd.f32 %v567_v2, %v2139_v55  ;;  %3631 = vst [vmem:[#allocation4_spill] sm:$0xff] %v2171_v45  ;;  %v2183_v2 = vadd.f32 %v344_v43, %v246_v37  ;;  %v346_v8 = vld [vmem:[%s1941_s21 + $0x160] sm:$0xff]  ;;  %v583_v16 = vsel %vm498_vm0, %v2171_v45, 0.0  ;;  %v255_v32 = vld [vmem:[%s1935_s18 + $0x198] sm:$0xff]  ;;  %v298_v6 = vld [vmem:[%s1935_s18 + $0x2f0] sm:$0xff] }
  0x34   : > { %3632 = vst [vmem:[#allocation5_spill] sm:$0xff] %v2178_v58  ;;  %3634 = vst [vmem:[#allocation7_spill] sm:$0xff] %v2187_v9  ;;  %v353_v37 = vld [vmem:[%s1941_s21 + $0x198] sm:$0xff]  ;;  %v580_v38 = vadd.f32 %v579_v62, %v2178_v58  ;;  %v2200_v43 = vadd.f32 %v346_v8, %v248_v3  ;;  %v587_v48 = vsel %vm498_vm0, %v2187_v9, 0.0  ;;  %v350_v45 = vld [vmem:[%s1941_s21 + $0x180] sm:$0xff] }
  0x35   : > { %553 = vadd.xlane.f32.xlu1 %v552_v24  ;;  %v571_v24 = vsel %vm498_vm0, %v2143_v61, 0.0  ;;  %3633 = vst [vmem:[#allocation6_spill] sm:$0xff] %v2183_v2  ;;  %v584_v46 = vadd.f32 %v583_v16, %v2183_v2  ;;  %v352_v3 = vld [vmem:[%s1941_s21 + $0x190] sm:$0xff]  ;;  %v257_v8 = vld [vmem:[%s1935_s18 + $0x1a8] sm:$0xff]  ;;  %v259_v9 = vld [vmem:[%s1935_s18 + $0x1b8] sm:$0xff] }
  0x36   : > { %v572_v54 = vadd.f32 %v571_v24, %v2156_v20  ;;  %v253_v24 = vld [vmem:[%s1935_s18 + $0x188] sm:$0xff]  ;;  %3636 = vst [vmem:[#allocation9_spill] sm:$0xff] %v2200_v43  ;;  %v354_v2 = vld [vmem:[%s1941_s21 + $0x1a0] sm:$0xff] }
  0x37   : > { %557 = vadd.xlane.f32.xlu0 %v556_v49  ;;  %v251_v49 = vld [vmem:[%s1935_s18 + $0x178] sm:$0xff]  ;;  %v2209_v34 = vadd.f32 %v351_v29, %v253_v24  ;;  %v355_v16 = vld [vmem:[%s1941_s21 + $0x1a8] sm:$0xff] }
  0x38   : > { %v2231_v58 = vadd.f32 %v355_v16, %v257_v8 }
  0x39   : > { %561 = vadd.xlane.f32.xlu1 %v560_v53  ;;  %v349_v53 = vld [vmem:[%s1941_s21 + $0x178] sm:$0xff]  ;;  %3638 = vst [vmem:[#allocation11_spill] sm:$0xff] %v2209_v34 }
  0x3a   : > { %3642 = vst [vmem:[#allocation15_spill] sm:$0xff] %v2231_v58 }
  0x3b   : > { %565 = vadd.xlane.f32.xlu0 %v564_v19  ;;  %v348_v19 = vld [vmem:[%s1941_s21 + $0x170] sm:$0xff] }
  0x3d   : > { %569 = vadd.xlane.f32.xlu1 %v568_v21  ;;  %v2193_v21 = vadd.f32 %v349_v53, %v251_v49  ;;  %v2205_v49 = vadd.f32 %v348_v19, %v250_v14  ;;  %v252_v53 = vld [vmem:[%s1935_s18 + $0x180] sm:$0xff]  ;;  %v357_v14 = vld [vmem:[%s1941_s21 + $0x1b8] sm:$0xff]  ;;  %v588_v19 = vadd.f32 %v587_v48, %v2200_v43 }
  0x3e   : > { %v2222_v24 = vadd.f32 %v350_v45, %v252_v53  ;;  %v356_v45 = vld [vmem:[%s1941_s21 + $0x1b0] sm:$0xff]  ;;  %v261_v53 = vld [vmem:[%s1935_s18 + $0x1c8] sm:$0xff] }
  0x3f   : > { %3635 = vst [vmem:[#allocation8_spill] sm:$0xff] %v2193_v21  ;;  %573 = vadd.xlane.f32.xlu0 %v572_v54  ;;  %3637 = vst [vmem:[#allocation10_spill] sm:$0xff] %v2205_v49  ;;  %v254_v54 = vld [vmem:[%s1935_s18 + $0x190] sm:$0xff]  ;;  %v591_v62 = vsel %vm498_vm0, %v2193_v21, 0.0  ;;  %v256_v21 = vld [vmem:[%s1935_s18 + $0x1a0] sm:$0xff] }
  0x40   : > { %3640 = vst [vmem:[#allocation13_spill] sm:$0xff] %v2222_v24  ;;  %v592_v29 = vadd.f32 %v591_v62, %v2205_v49  ;;  %v359_v62 = vld [vmem:[%s1941_s21 + $0x1c8] sm:$0xff]  ;;  %v2244_v8 = vadd.f32 %v354_v2, %v256_v21  ;;  %v358_v49 = vld [vmem:[%s1941_s21 + $0x1c0] sm:$0xff]  ;;  %v360_v2 = vld [vmem:[%s1941_s21 + $0x1d0] sm:$0xff] }
  0x41   : > { %577 = vadd.xlane.f32.xlu1 %v576_v59  ;;  %v2215_v59 = vadd.f32 %v353_v37, %v255_v32  ;;  %v595_v32 = vsel %vm498_vm0, %v2209_v34, 0.0  ;;  %v2227_v37 = vadd.f32 %v352_v3, %v254_v54  ;;  %v263_v34 = vld [vmem:[%s1935_s18 + $0x1d8] sm:$0xff]  ;;  %v2253_v43 = vadd.f32 %v359_v62, %v261_v53 }
  0x42   : > { %v361_v54 = vld [vmem:[%s1941_s21 + $0x1d8] sm:$0xff]  ;;  %v596_v3 = vadd.f32 %v595_v32, %v2222_v24  ;;  %3644 = vst [vmem:[#allocation17_spill] sm:$0xff] %v2244_v8 }
  0x43   : > { %3639 = vst [vmem:[#allocation12_spill] sm:$0xff] %v2215_v59  ;;  %581 = vadd.xlane.f32.xlu0 %v580_v38  ;;  %3641 = vst [vmem:[#allocation14_spill] sm:$0xff] %v2227_v37  ;;  %v258_v38 = vld [vmem:[%s1935_s18 + $0x1b0] sm:$0xff]  ;;  %v599_v48 = vsel %vm498_vm0, %v2215_v59, 0.0  ;;  %v260_v59 = vld [vmem:[%s1935_s18 + $0x1c0] sm:$0xff]  ;;  %v2259_v21 = vadd.f32 %v361_v54, %v263_v34  ;;  %v611_v34 = vsel %vm498_vm0, %v2253_v43, 0.0 }
  0x44   : > { %v600_v16 = vadd.f32 %v599_v48, %v2227_v37  ;;  %3646 = vst [vmem:[#allocation19_spill] sm:$0xff] %v2253_v43  ;;  %v363_v48 = vld [vmem:[%s1941_s21 + $0x1e8] sm:$0xff]  ;;  %v2266_v53 = vadd.f32 %v358_v49, %v260_v59  ;;  %v362_v37 = vld [vmem:[%s1941_s21 + $0x1e0] sm:$0xff]  ;;  %v364_v49 = vld [vmem:[%s1941_s21 + $0x1f0] sm:$0xff] }
  0x45   : > { %585 = vadd.xlane.f32.xlu1 %v584_v46  ;;  %v2237_v46 = vadd.f32 %v357_v14, %v259_v9  ;;  %v603_v9 = vsel %vm498_vm0, %v2231_v58, 0.0  ;;  %v2249_v14 = vadd.f32 %v356_v45, %v258_v38  ;;  %3647 = vst [vmem:[#allocation20_spill] sm:$0xff] %v2259_v21  ;;  %v267_v58 = vld [vmem:[%s1935_s18 + $0x1f8] sm:$0xff] }
  0x46   : > { %v365_v38 = vld [vmem:[%s1941_s21 + $0x1f8] sm:$0xff]  ;;  %v604_v45 = vadd.f32 %v603_v9, %v2244_v8  ;;  %3648 = vst [vmem:[#allocation21_spill] sm:$0xff] %v2266_v53  ;;  %v615_v9 = vsel %vm498_vm0, %v2259_v21, 0.0  ;;  %v268_v21 = vld [vmem:[%s1935_s18 + $0x200] sm:$0xff] }
  0x47   : > { %3643 = vst [vmem:[#allocation16_spill] sm:$0xff] %v2237_v46  ;;  %589 = vadd.xlane.f32.xlu0 %v588_v19  ;;  %3645 = vst [vmem:[#allocation18_spill] sm:$0xff] %v2249_v14  ;;  %v262_v19 = vld [vmem:[%s1935_s18 + $0x1d0] sm:$0xff]  ;;  %v607_v32 = vsel %vm498_vm0, %v2237_v46, 0.0  ;;  %v264_v46 = vld [vmem:[%s1935_s18 + $0x1e0] sm:$0xff]  ;;  %v2281_v59 = vadd.f32 %v365_v38, %v267_v58 }
  0x48   : > { %v608_v62 = vadd.f32 %v607_v32, %v2249_v14  ;;  %v2271_v54 = vadd.f32 %v360_v2, %v262_v19  ;;  %v367_v32 = vld [vmem:[%s1941_s21 + $0x208] sm:$0xff]  ;;  %v271_v43 = vld [vmem:[%s1935_s18 + $0x218] sm:$0xff]  ;;  %v612_v2 = vadd.f32 %v611_v34, %v2266_v53  ;;  %v366_v14 = vld [vmem:[%s1941_s21 + $0x200] sm:$0xff] }
  0x49   : > { %593 = vadd.xlane.f32.xlu1 %v592_v29  ;;  %v265_v29 = vld [vmem:[%s1935_s18 + $0x1e8] sm:$0xff]  ;;  %3651 = vst [vmem:[#allocation24_spill] sm:$0xff] %v2281_v59  ;;  %v369_v19 = vld [vmem:[%s1941_s21 + $0x218] sm:$0xff]  ;;  %v623_v34 = vsel %vm498_vm0, %v2281_v59, 0.0  ;;  %v272_v59 = vld [vmem:[%s1935_s18 + $0x220] sm:$0xff] }
  0x4a   : > { %3649 = vst [vmem:[#allocation22_spill] sm:$0xff] %v2271_v54  ;;  %v2275_v24 = vadd.f32 %v363_v48, %v265_v29  ;;  %v2288_v29 = vadd.f32 %v362_v37, %v264_v46  ;;  %v616_v48 = vadd.f32 %v615_v9, %v2271_v54  ;;  %v368_v37 = vld [vmem:[%s1941_s21 + $0x210] sm:$0xff]  ;;  %v2303_v46 = vadd.f32 %v369_v19, %v271_v43  ;;  %v371_v9 = vld [vmem:[%s1941_s21 + $0x228] sm:$0xff]  ;;  %v370_v54 = vld [vmem:[%s1941_s21 + $0x220] sm:$0xff] }
  0x4b   : > { %597 = vadd.xlane.f32.xlu0 %v596_v3  ;;  %v266_v3 = vld [vmem:[%s1935_s18 + $0x1f0] sm:$0xff] }
  0x4c   : > { %3650 = vst [vmem:[#allocation23_spill] sm:$0xff] %v2275_v24  ;;  %3652 = vst [vmem:[#allocation25_spill] sm:$0xff] %v2288_v29  ;;  %v619_v58 = vsel %vm498_vm0, %v2275_v24, 0.0  ;;  %v2293_v38 = vadd.f32 %v364_v49, %v266_v3  ;;  %v275_v24 = vld [vmem:[%s1935_s18 + $0x238] sm:$0xff] }
  0x4d   : > { %601 = vadd.xlane.f32.xlu1 %v600_v16  ;;  %v269_v16 = vld [vmem:[%s1935_s18 + $0x208] sm:$0xff]  ;;  %3655 = vst [vmem:[#allocation28_spill] sm:$0xff] %v2303_v46  ;;  %v373_v3 = vld [vmem:[%s1941_s21 + $0x238] sm:$0xff]  ;;  %v620_v49 = vadd.f32 %v619_v58, %v2288_v29  ;;  %v631_v58 = vsel %vm498_vm0, %v2303_v46, 0.0  ;;  %v276_v46 = vld [vmem:[%s1935_s18 + $0x240] sm:$0xff] }
  0x4e   : > { %3653 = vst [vmem:[#allocation26_spill] sm:$0xff] %v2293_v38  ;;  %v2297_v8 = vadd.f32 %v367_v32, %v269_v16  ;;  %v2310_v16 = vadd.f32 %v366_v14, %v268_v21  ;;  %v624_v32 = vadd.f32 %v623_v34, %v2293_v38  ;;  %v372_v14 = vld [vmem:[%s1941_s21 + $0x230] sm:$0xff]  ;;  %v2325_v21 = vadd.f32 %v373_v3, %v275_v24  ;;  %v375_v34 = vld [vmem:[%s1941_s21 + $0x248] sm:$0xff]  ;;  %v374_v38 = vld [vmem:[%s1941_s21 + $0x240] sm:$0xff] }
  0x4f   : > { %605 = vadd.xlane.f32.xlu0 %v604_v45  ;;  %v270_v45 = vld [vmem:[%s1935_s18 + $0x210] sm:$0xff] }
  0x50   : > { %3654 = vst [vmem:[#allocation27_spill] sm:$0xff] %v2297_v8  ;;  %3656 = vst [vmem:[#allocation29_spill] sm:$0xff] %v2310_v16  ;;  %v627_v43 = vsel %vm498_vm0, %v2297_v8, 0.0  ;;  %v2315_v19 = vadd.f32 %v368_v37, %v270_v45  ;;  %v279_v8 = vld [vmem:[%s1935_s18 + $0x258] sm:$0xff] }
  0x51   : > { %609 = vadd.xlane.f32.xlu1 %v608_v62  ;;  %v273_v62 = vld [vmem:[%s1935_s18 + $0x228] sm:$0xff]  ;;  %3659 = vst [vmem:[#allocation32_spill] sm:$0xff] %v2325_v21  ;;  %v377_v45 = vld [vmem:[%s1941_s21 + $0x258] sm:$0xff]  ;;  %v628_v37 = vadd.f32 %v627_v43, %v2310_v16  ;;  %v639_v43 = vsel %vm498_vm0, %v2325_v21, 0.0  ;;  %v280_v21 = vld [vmem:[%s1935_s18 + $0x260] sm:$0xff] }
  0x52   : > { %3657 = vst [vmem:[#allocation30_spill] sm:$0xff] %v2315_v19  ;;  %v2319_v53 = vadd.f32 %v371_v9, %v273_v62  ;;  %v2332_v62 = vadd.f32 %v370_v54, %v272_v59  ;;  %v632_v9 = vadd.f32 %v631_v58, %v2315_v19  ;;  %v376_v54 = vld [vmem:[%s1941_s21 + $0x250] sm:$0xff]  ;;  %v2347_v59 = vadd.f32 %v377_v45, %v279_v8  ;;  %v379_v58 = vld [vmem:[%s1941_s21 + $0x268] sm:$0xff]  ;;  %v378_v19 = vld [vmem:[%s1941_s21 + $0x260] sm:$0xff] }
  0x53   : > { %613 = vadd.xlane.f32.xlu0 %v612_v2  ;;  %v274_v2 = vld [vmem:[%s1935_s18 + $0x230] sm:$0xff] }
  0x54   : > { %3658 = vst [vmem:[#allocation31_spill] sm:$0xff] %v2319_v53  ;;  %3660 = vst [vmem:[#allocation33_spill] sm:$0xff] %v2332_v62  ;;  %v635_v24 = vsel %vm498_vm0, %v2319_v53, 0.0  ;;  %v2337_v3 = vadd.f32 %v372_v14, %v274_v2  ;;  %v283_v53 = vld [vmem:[%s1935_s18 + $0x278] sm:$0xff] }
  0x55   : > { %617 = vadd.xlane.f32.xlu1 %v616_v48  ;;  %v277_v48 = vld [vmem:[%s1935_s18 + $0x248] sm:$0xff]  ;;  %3663 = vst [vmem:[#allocation36_spill] sm:$0xff] %v2347_v59  ;;  %v381_v2 = vld [vmem:[%s1941_s21 + $0x278] sm:$0xff]  ;;  %v636_v14 = vadd.f32 %v635_v24, %v2332_v62  ;;  %v647_v24 = vsel %vm498_vm0, %v2347_v59, 0.0  ;;  %v284_v59 = vld [vmem:[%s1935_s18 + $0x280] sm:$0xff] }
  0x56   : > { %3661 = vst [vmem:[#allocation34_spill] sm:$0xff] %v2337_v3  ;;  %v2341_v29 = vadd.f32 %v375_v34, %v277_v48  ;;  %v2354_v48 = vadd.f32 %v374_v38, %v276_v46  ;;  %v640_v34 = vadd.f32 %v639_v43, %v2337_v3  ;;  %v380_v38 = vld [vmem:[%s1941_s21 + $0x270] sm:$0xff]  ;;  %v2369_v46 = vadd.f32 %v381_v2, %v283_v53  ;;  %v383_v43 = vld [vmem:[%s1941_s21 + $0x288] sm:$0xff]  ;;  %v382_v3 = vld [vmem:[%s1941_s21 + $0x280] sm:$0xff] }
  0x57   : > { %621 = vadd.xlane.f32.xlu0 %v620_v49  ;;  %v278_v49 = vld [vmem:[%s1935_s18 + $0x250] sm:$0xff] }
  0x58   : > { %3662 = vst [vmem:[#allocation35_spill] sm:$0xff] %v2341_v29  ;;  %3664 = vst [vmem:[#allocation37_spill] sm:$0xff] %v2354_v48  ;;  %v643_v8 = vsel %vm498_vm0, %v2341_v29, 0.0  ;;  %v2359_v45 = vadd.f32 %v376_v54, %v278_v49  ;;  %v287_v29 = vld [vmem:[%s1935_s18 + $0x298] sm:$0xff] }
  0x59   : > { %625 = vadd.xlane.f32.xlu1 %v624_v32  ;;  %v281_v32 = vld [vmem:[%s1935_s18 + $0x268] sm:$0xff]  ;;  %3667 = vst [vmem:[#allocation40_spill] sm:$0xff] %v2369_v46  ;;  %v385_v49 = vld [vmem:[%s1941_s21 + $0x298] sm:$0xff]  ;;  %v644_v54 = vadd.f32 %v643_v8, %v2354_v48  ;;  %v655_v8 = vsel %vm498_vm0, %v2369_v46, 0.0  ;;  %v288_v46 = vld [vmem:[%s1935_s18 + $0x2a0] sm:$0xff] }
  0x5a   : > { %3665 = vst [vmem:[#allocation38_spill] sm:$0xff] %v2359_v45  ;;  %v2363_v16 = vadd.f32 %v379_v58, %v281_v32  ;;  %v2376_v32 = vadd.f32 %v378_v19, %v280_v21  ;;  %v648_v58 = vadd.f32 %v647_v24, %v2359_v45  ;;  %v384_v19 = vld [vmem:[%s1941_s21 + $0x290] sm:$0xff]  ;;  %v2391_v21 = vadd.f32 %v385_v49, %v287_v29  ;;  %v387_v24 = vld [vmem:[%s1941_s21 + $0x2a8] sm:$0xff]  ;;  %v386_v45 = vld [vmem:[%s1941_s21 + $0x2a0] sm:$0xff] }
  0x5b   : > { %629 = vadd.xlane.f32.xlu0 %v628_v37  ;;  %v282_v37 = vld [vmem:[%s1935_s18 + $0x270] sm:$0xff] }
  0x5c   : > { %3666 = vst [vmem:[#allocation39_spill] sm:$0xff] %v2363_v16  ;;  %3668 = vst [vmem:[#allocation41_spill] sm:$0xff] %v2376_v32  ;;  %v651_v53 = vsel %vm498_vm0, %v2363_v16, 0.0  ;;  %v2381_v2 = vadd.f32 %v380_v38, %v282_v37  ;;  %v291_v16 = vld [vmem:[%s1935_s18 + $0x2b8] sm:$0xff] }
  0x5d   : > { %633 = vadd.xlane.f32.xlu1 %v632_v9  ;;  %v285_v9 = vld [vmem:[%s1935_s18 + $0x288] sm:$0xff]  ;;  %3671 = vst [vmem:[#allocation44_spill] sm:$0xff] %v2391_v21  ;;  %v389_v37 = vld [vmem:[%s1941_s21 + $0x2b8] sm:$0xff]  ;;  %v652_v38 = vadd.f32 %v651_v53, %v2376_v32  ;;  %v663_v53 = vsel %vm498_vm0, %v2391_v21, 0.0  ;;  %v292_v21 = vld [vmem:[%s1935_s18 + $0x2c0] sm:$0xff] }
  0x5e   : > { %3669 = vst [vmem:[#allocation42_spill] sm:$0xff] %v2381_v2  ;;  %v2385_v62 = vadd.f32 %v383_v43, %v285_v9  ;;  %v2398_v9 = vadd.f32 %v382_v3, %v284_v59  ;;  %v656_v43 = vadd.f32 %v655_v8, %v2381_v2  ;;  %v388_v3 = vld [vmem:[%s1941_s21 + $0x2b0] sm:$0xff]  ;;  %v2413_v59 = vadd.f32 %v389_v37, %v291_v16  ;;  %v391_v8 = vld [vmem:[%s1941_s21 + $0x2c8] sm:$0xff]  ;;  %v390_v2 = vld [vmem:[%s1941_s21 + $0x2c0] sm:$0xff] }
  0x5f   : > { %637 = vadd.xlane.f32.xlu0 %v636_v14  ;;  %v286_v14 = vld [vmem:[%s1935_s18 + $0x290] sm:$0xff] }
  0x60   : > { %3670 = vst [vmem:[#allocation43_spill] sm:$0xff] %v2385_v62  ;;  %3672 = vst [vmem:[#allocation45_spill] sm:$0xff] %v2398_v9  ;;  %v659_v29 = vsel %vm498_vm0, %v2385_v62, 0.0  ;;  %v2403_v49 = vadd.f32 %v384_v19, %v286_v14  ;;  %v295_v62 = vld [vmem:[%s1935_s18 + $0x2d8] sm:$0xff] }
  0x61   : > { %641 = vadd.xlane.f32.xlu1 %v640_v34  ;;  %v289_v34 = vld [vmem:[%s1935_s18 + $0x2a8] sm:$0xff]  ;;  %3675 = vst [vmem:[#allocation48_spill] sm:$0xff] %v2413_v59  ;;  %v393_v14 = vld [vmem:[%s1941_s21 + $0x2d8] sm:$0xff]  ;;  %v660_v19 = vadd.f32 %v659_v29, %v2398_v9  ;;  %v671_v29 = vsel %vm498_vm0, %v2413_v59, 0.0 }
  0x62   : > { %3673 = vst [vmem:[#allocation46_spill] sm:$0xff] %v2403_v49  ;;  %v2407_v48 = vadd.f32 %v387_v24, %v289_v34  ;;  %v2420_v34 = vadd.f32 %v386_v45, %v288_v46  ;;  %v664_v24 = vadd.f32 %v663_v53, %v2403_v49  ;;  %v392_v45 = vld [vmem:[%s1941_s21 + $0x2d0] sm:$0xff]  ;;  %v2435_v46 = vadd.f32 %v393_v14, %v295_v62  ;;  %v395_v53 = vld [vmem:[%s1941_s21 + $0x2e8] sm:$0xff]  ;;  %v296_v14 = vld [vmem:[%s1935_s18 + $0x2e0] sm:$0xff] }
  0x63   : > { %645 = vadd.xlane.f32.xlu0 %v644_v54  ;;  %v290_v54 = vld [vmem:[%s1935_s18 + $0x2b0] sm:$0xff]  ;;  %v394_v49 = vld [vmem:[%s1941_s21 + $0x2e0] sm:$0xff] }
  0x64   : > { %3674 = vst [vmem:[#allocation47_spill] sm:$0xff] %v2407_v48  ;;  %v667_v16 = vsel %vm498_vm0, %v2407_v48, 0.0  ;;  %v2425_v37 = vadd.f32 %v388_v3, %v290_v54  ;;  %3678 = vst [vmem:[#allocation51_spill] sm:$0xff] %v2435_v46  ;;  %v299_v48 = vld [vmem:[%s1935_s18 + $0x2f8] sm:$0xff] }
  0x65   : > { %649 = vadd.xlane.f32.xlu1 %v648_v58  ;;  %v293_v58 = vld [vmem:[%s1935_s18 + $0x2c8] sm:$0xff]  ;;  %v397_v54 = vld [vmem:[%s1941_s21 + $0x2f8] sm:$0xff]  ;;  %v668_v3 = vadd.f32 %v667_v16, %v2420_v34 }
  0x66   : > { %3676 = vst [vmem:[#allocation49_spill] sm:$0xff] %v2425_v37  ;;  %v2429_v32 = vadd.f32 %v391_v8, %v293_v58  ;;  %v2442_v58 = vadd.f32 %v390_v2, %v292_v21  ;;  %v672_v8 = vadd.f32 %v671_v29, %v2425_v37  ;;  %v396_v2 = vld [vmem:[%s1941_s21 + $0x2f0] sm:$0xff]  ;;  %v2457_v21 = vadd.f32 %v397_v54, %v299_v48  ;;  %v399_v16 = vld [vmem:[%s1941_s21 + $0x308] sm:$0xff] }
  0x67   : > { %653 = vadd.xlane.f32.xlu0 %v652_v38  ;;  %v294_v38 = vld [vmem:[%s1935_s18 + $0x2d0] sm:$0xff] }
  0x68   : > { %3677 = vst [vmem:[#allocation50_spill] sm:$0xff] %v2429_v32  ;;  %v675_v59 = vsel %vm498_vm0, %v2429_v32, 0.0  ;;  %v2447_v62 = vadd.f32 %v392_v45, %v294_v38  ;;  %v2462_v38 = vadd.f32 %v394_v49, %v296_v14  ;;  %v300_v32 = vld [vmem:[%s1935_s18 + $0x300] sm:$0xff]  ;;  %v687_v48 = vsel %vm498_vm0, %v2457_v21, 0.0 }
  0x69   : > { %657 = vadd.xlane.f32.xlu1 %v656_v43  ;;  %v297_v43 = vld [vmem:[%s1935_s18 + $0x2e8] sm:$0xff]  ;;  %v676_v29 = vadd.f32 %v675_v59, %v2442_v58 }
  0x6a   : > { %v2451_v9 = vadd.f32 %v395_v53, %v297_v43  ;;  %v2467_v53 = vadd.f32 %v396_v2, %v298_v6 }
  0x6b   : > { %661 = vadd.xlane.f32.xlu0 %v660_v19  ;;  %v679_v19 = vsel %vm498_vm0, %v2435_v46, 0.0  ;;  %v398_v46 = vld [vmem:[%s1941_s21 + $0x300] sm:$0xff] }
  0x6c   : > { %v680_v45 = vadd.f32 %v679_v19, %v2447_v62  ;;  %v683_v43 = vsel %vm498_vm0, %v2451_v9, 0.0  ;;  %v2476_v49 = vadd.f32 %v398_v46, %v300_v32  ;;  %v688_v54 = vadd.f32 %v687_v48, %v2467_v53 }
  0x6d   : > { %665 = vadd.xlane.f32.xlu1 %v664_v24  ;;  %v301_v24 = vld [vmem:[%s1935_s18 + $0x308] sm:$0xff]  ;;  %v684_v59 = vadd.f32 %v683_v43, %v2462_v38 }
  0x6e   : > { %v2471_v37 = vadd.f32 %v399_v16, %v301_v24 }
  0x6f   : > { %669 = vadd.xlane.f32.xlu0 %v668_v3 }
  0x70   : > { %v691_v3 = vsel %vm498_vm0, %v2471_v37, 0.0 }
  0x71   : > { %673 = vadd.xlane.f32.xlu1 %v672_v8  ;;  %v692_v6 = vadd.f32 %v691_v3, %v2476_v49 }
  0x73   : > { %677 = vadd.xlane.f32.xlu0 %v676_v29 }
  0x75   : > { %681 = vadd.xlane.f32.xlu1 %v680_v45 }
  0x77   : > { %685 = vadd.xlane.f32.xlu0 %v684_v59 }
  0x79   : > { %689 = vadd.xlane.f32.xlu1 %v688_v54 }
  0x7b   : > { %693 = vadd.xlane.f32.xlu0 %v692_v6 }
  0xa8   : > { %v502_v8 = vpop.xlane.xlu0 %501 }
  0xa9   : > { %v695_v14 = vmul.f32 0.0052083335, %v502_v8 }
  0xaa   : > { %v510_v19 = vpop.xlane.xlu1 %509 }
  0xab   : > { %v697_v2 = vmul.f32 0.0052083335, %v510_v19  ;;  %v2483_v24 = vsub.f32 %v1947_v4, %v695_v14  ;;  %v2486_v32 = vsub.f32 %v1951_v7, %v695_v14 }
  0xac   : > { %v506_v29 = vpop.xlane.xlu0 %505 }
  0xad   : > { %v2489_v46 = vsub.f32 %v1956_v11, %v697_v2  ;;  %v2492_v16 = vsub.f32 %v1958_v12, %v697_v2  ;;  %v696_v45 = vmul.f32 0.0052083335, %v506_v29  ;;  %v842_v48 = vmul.f32 %v2483_v24, %v2483_v24 }
  0xae   : > { %v514_v43 = vpop.xlane.xlu1 %513  ;;  %v843_v59 = vmul.f32 %v2486_v32, %v2486_v32 }
  0xaf   : > { %v698_v4 = vmul.f32 0.0052083335, %v514_v43  ;;  %v846_v7 = vmul.f32 %v2489_v46, %v2489_v46  ;;  %v847_v11 = vmul.f32 %v2492_v16, %v2492_v16  ;;  %v2503_v54 = vsub.f32 %v1965_v17, %v696_v45 }
  0xb0   : > { %v2506_v12 = vsub.f32 %v1967_v18, %v696_v45  ;;  %v940_v3 = vsel %vm498_vm0, %v843_v59, 0.0  ;;  %v518_v14 = vpop.xlane.xlu0 %517 }
  0xb1   : > { %v2510_v6 = vsub.f32 %v1976_v25, %v698_v4  ;;  %v2513_v8 = vsub.f32 %v1983_v30, %v698_v4  ;;  %v941_v19 = vadd.f32 %v940_v3, %v842_v48  ;;  %v948_v2 = vsel %vm498_vm0, %v847_v11, 0.0 }
  0xb2   : > { %v699_v29 = vmul.f32 0.0052083335, %v518_v14  ;;  %v522_v43 = vpop.xlane.xlu1 %521  ;;  %v844_v17 = vmul.f32 %v2503_v54, %v2503_v54  ;;  %v845_v18 = vmul.f32 %v2506_v12, %v2506_v12  ;;  %v949_v59 = vadd.f32 %v948_v2, %v846_v7 }
  0xb3   : > { %3679 = vst [vmem:[#allocation52_spill] sm:$0xff] %v2513_v8  ;;  %942 = vadd.xlane.f32.xlu1 %v941_v19  ;;  %v700_v45 = vmul.f32 0.0052083335, %v522_v43  ;;  %v848_v25 = vmul.f32 %v2510_v6, %v2510_v6  ;;  %v849_v30 = vmul.f32 %v2513_v8, %v2513_v8 }
  0xb4   : > { %v2525_v48 = vsub.f32 %v1989_v35, %v699_v29  ;;  %v2528_v4 = vsub.f32 %v1991_v36, %v699_v29  ;;  %v944_v11 = vsel %vm498_vm0, %v845_v18, 0.0  ;;  %v526_v7 = vpop.xlane.xlu0 %525 }
  0xb5   : > { %v2532_v3 = vsub.f32 %v1998_v41, %v700_v45  ;;  %v2535_v14 = vsub.f32 %v2000_v42, %v700_v45  ;;  %v945_v19 = vadd.f32 %v944_v11, %v844_v17  ;;  %v952_v2 = vsel %vm498_vm0, %v849_v30, 0.0 }
  0xb6   : > { %v701_v43 = vmul.f32 0.0052083335, %v526_v7  ;;  %v530_v8 = vpop.xlane.xlu1 %529  ;;  %v850_v35 = vmul.f32 %v2525_v48, %v2525_v48  ;;  %v851_v36 = vmul.f32 %v2528_v4, %v2528_v4  ;;  %v953_v41 = vadd.f32 %v952_v2, %v848_v25 }
  0xb7   : > { %950 = vadd.xlane.f32.xlu1 %v949_v59  ;;  %946 = vadd.xlane.f32.xlu0 %v945_v19  ;;  %v702_v29 = vmul.f32 0.0052083335, %v530_v8  ;;  %v852_v42 = vmul.f32 %v2532_v3, %v2532_v3  ;;  %v853_v17 = vmul.f32 %v2535_v14, %v2535_v14 }
  0xb8   : > { %v2547_v18 = vsub.f32 %v2018_v56, %v701_v43  ;;  %v2550_v45 = vsub.f32 %v2013_v52, %v701_v43  ;;  %v956_v30 = vsel %vm498_vm0, %v851_v36, 0.0  ;;  %v534_v59 = vpop.xlane.xlu0 %533 }
  0xb9   : > { %v2554_v11 = vsub.f32 %v2028_v63, %v702_v29  ;;  %v2557_v8 = vsub.f32 %v2020_v57, %v702_v29  ;;  %v957_v25 = vadd.f32 %v956_v30, %v850_v35  ;;  %v960_v7 = vsel %vm498_vm0, %v853_v17, 0.0 }
  0xba   : > { %v703_v19 = vmul.f32 0.0052083335, %v534_v59  ;;  %v538_v2 = vpop.xlane.xlu1 %537  ;;  %v854_v56 = vmul.f32 %v2547_v18, %v2547_v18  ;;  %v855_v52 = vmul.f32 %v2550_v45, %v2550_v45  ;;  %v961_v63 = vadd.f32 %v960_v7, %v852_v42 }
  0xbb   : > { %954 = vadd.xlane.f32.xlu0 %v953_v41  ;;  %958 = vadd.xlane.f32.xlu1 %v957_v25  ;;  %v704_v43 = vmul.f32 0.0052083335, %v538_v2  ;;  %v856_v57 = vmul.f32 %v2554_v11, %v2554_v11  ;;  %v857_v35 = vmul.f32 %v2557_v8, %v2557_v8 }
  0xbc   : > { %v2569_v36 = vsub.f32 %v2044_v15, %v703_v19  ;;  %v2572_v29 = vsub.f32 %v2031_v1, %v703_v19  ;;  %v964_v17 = vsel %vm498_vm0, %v855_v52, 0.0  ;;  %v542_v42 = vpop.xlane.xlu0 %541 }
  0xbd   : > { %v2576_v30 = vsub.f32 %v2051_v22, %v704_v43  ;;  %v2579_v41 = vsub.f32 %v2040_v10, %v704_v43  ;;  %v965_v59 = vadd.f32 %v964_v17, %v854_v56  ;;  %v968_v25 = vsel %vm498_vm0, %v857_v35, 0.0 }
  0xbe   : > { %v705_v7 = vmul.f32 0.0052083335, %v542_v42  ;;  %v546_v2 = vpop.xlane.xlu1 %545  ;;  %v858_v15 = vmul.f32 %v2569_v36, %v2569_v36  ;;  %v859_v1 = vmul.f32 %v2572_v29, %v2572_v29  ;;  %v969_v22 = vadd.f32 %v968_v25, %v856_v57 }
  0xbf   : > { %962 = vadd.xlane.f32.xlu0 %v961_v63  ;;  %966 = vadd.xlane.f32.xlu1 %v965_v59  ;;  %v706_v19 = vmul.f32 0.0052083335, %v546_v2  ;;  %v860_v10 = vmul.f32 %v2576_v30, %v2576_v30  ;;  %v861_v56 = vmul.f32 %v2579_v41, %v2579_v41 }
  0xc0   : > { %v2591_v52 = vsub.f32 %v2068_v39, %v705_v7  ;;  %v2594_v43 = vsub.f32 %v2055_v26, %v705_v7  ;;  %v972_v35 = vsel %vm498_vm0, %v859_v1, 0.0  ;;  %v550_v57 = vpop.xlane.xlu0 %549 }
  0xc1   : > { %v2598_v17 = vsub.f32 %v2073_v44, %v706_v19  ;;  %v2601_v63 = vsub.f32 %v2061_v31, %v706_v19  ;;  %v973_v42 = vadd.f32 %v972_v35, %v858_v15  ;;  %v976_v59 = vsel %vm498_vm0, %v861_v56, 0.0 }
  0xc2   : > { %v707_v25 = vmul.f32 0.0052083335, %v550_v57  ;;  %v554_v2 = vpop.xlane.xlu1 %553  ;;  %v862_v39 = vmul.f32 %v2591_v52, %v2591_v52  ;;  %v863_v26 = vmul.f32 %v2594_v43, %v2594_v43  ;;  %v977_v44 = vadd.f32 %v976_v59, %v860_v10 }
  0xc3   : > { %970 = vadd.xlane.f32.xlu0 %v969_v22  ;;  %974 = vadd.xlane.f32.xlu1 %v973_v42  ;;  %v708_v7 = vmul.f32 0.0052083335, %v554_v2  ;;  %v864_v31 = vmul.f32 %v2598_v17, %v2598_v17  ;;  %v865_v15 = vmul.f32 %v2601_v63, %v2601_v63 }
  0xc4   : > { %v2613_v1 = vsub.f32 %v2090_v60, %v707_v25  ;;  %v2616_v19 = vsub.f32 %v2077_v47, %v707_v25  ;;  %v980_v56 = vsel %vm498_vm0, %v863_v26, 0.0  ;;  %v558_v10 = vpop.xlane.xlu0 %557 }
  0xc5   : > { %v2620_v35 = vsub.f32 %v2095_v0, %v708_v7  ;;  %v2623_v22 = vsub.f32 %v2083_v51, %v708_v7  ;;  %v981_v57 = vadd.f32 %v980_v56, %v862_v39  ;;  %v984_v42 = vsel %vm498_vm0, %v865_v15, 0.0 }
  0xc6   : > { %v709_v59 = vmul.f32 0.0052083335, %v558_v10  ;;  %v562_v2 = vpop.xlane.xlu1 %561  ;;  %v866_v60 = vmul.f32 %v2613_v1, %v2613_v1  ;;  %v867_v47 = vmul.f32 %v2616_v19, %v2616_v19  ;;  %v985_v0 = vadd.f32 %v984_v42, %v864_v31 }
  0xc7   : > { %978 = vadd.xlane.f32.xlu0 %v977_v44  ;;  %982 = vadd.xlane.f32.xlu1 %v981_v57  ;;  %v710_v25 = vmul.f32 0.0052083335, %v562_v2  ;;  %v868_v51 = vmul.f32 %v2620_v35, %v2620_v35  ;;  %v869_v39 = vmul.f32 %v2623_v22, %v2623_v22 }
  0xc8   : > { %v2635_v26 = vsub.f32 %v2112_v23, %v709_v59  ;;  %v2638_v7 = vsub.f32 %v2099_v5, %v709_v59  ;;  %v988_v15 = vsel %vm498_vm0, %v867_v47, 0.0  ;;  %v566_v31 = vpop.xlane.xlu0 %565 }
  0xc9   : > { %v2642_v56 = vsub.f32 %v2117_v28, %v710_v25  ;;  %v2645_v44 = vsub.f32 %v2105_v13, %v710_v25  ;;  %v989_v10 = vadd.f32 %v988_v15, %v866_v60  ;;  %v992_v57 = vsel %vm498_vm0, %v869_v39, 0.0 }
  0xca   : > { %v711_v42 = vmul.f32 0.0052083335, %v566_v31  ;;  %v570_v2 = vpop.xlane.xlu1 %569  ;;  %v870_v23 = vmul.f32 %v2635_v26, %v2635_v26  ;;  %v871_v5 = vmul.f32 %v2638_v7, %v2638_v7  ;;  %v993_v28 = vadd.f32 %v992_v57, %v868_v51 }
  0xcb   : > { %986 = vadd.xlane.f32.xlu0 %v985_v0  ;;  %990 = vadd.xlane.f32.xlu1 %v989_v10  ;;  %v712_v59 = vmul.f32 0.0052083335, %v570_v2  ;;  %v872_v13 = vmul.f32 %v2642_v56, %v2642_v56  ;;  %v873_v60 = vmul.f32 %v2645_v44, %v2645_v44 }
  0xcc   : > { %v2657_v47 = vsub.f32 %v2134_v50, %v711_v42  ;;  %v2660_v25 = vsub.f32 %v2121_v33, %v711_v42  ;;  %v996_v39 = vsel %vm498_vm0, %v871_v5, 0.0  ;;  %v574_v51 = vpop.xlane.xlu0 %573 }
  0xcd   : > { %v2664_v15 = vsub.f32 %v2139_v55, %v712_v59  ;;  %v2667_v0 = vsub.f32 %v2127_v40, %v712_v59  ;;  %v997_v31 = vadd.f32 %v996_v39, %v870_v23  ;;  %v1000_v10 = vsel %vm498_vm0, %v873_v60, 0.0 }
  0xce   : > { %v713_v57 = vmul.f32 0.0052083335, %v574_v51  ;;  %v578_v2 = vpop.xlane.xlu1 %577  ;;  %v874_v50 = vmul.f32 %v2657_v47, %v2657_v47  ;;  %v875_v33 = vmul.f32 %v2660_v25, %v2660_v25  ;;  %v1001_v55 = vadd.f32 %v1000_v10, %v872_v13 }
  0xcf   : > { %3680 = vst [vmem:[#allocation53_spill] sm:$0xff] %v2664_v15  ;;  %3681 = vst [vmem:[#allocation54_spill] sm:$0xff] %v2667_v0  ;;  %994 = vadd.xlane.f32.xlu0 %v993_v28  ;;  %998 = vadd.xlane.f32.xlu1 %v997_v31  ;;  %v714_v42 = vmul.f32 0.0052083335, %v578_v2  ;;  %v876_v40 = vmul.f32 %v2664_v15, %v2664_v15  ;;  %v877_v23 = vmul.f32 %v2667_v0, %v2667_v0  ;;  %v3684_v28 = vld [vmem:[#allocation2_spill] sm:$0xff] }
  0xd0   : > { %v2679_v5 = vsub.f32 %v2156_v20, %v713_v57  ;;  %v2682_v59 = vsub.f32 %v2143_v61, %v713_v57  ;;  %v1004_v60 = vsel %vm498_vm0, %v875_v33, 0.0  ;;  %v582_v13 = vpop.xlane.xlu0 %581  ;;  %v3690_v15 = vld [vmem:[#allocation6_spill] sm:$0xff] }
  0xd1   : > { %v2686_v39 = vsub.f32 %v2161_v27, %v714_v42  ;;  %v2689_v51 = vsub.f32 %v3684_v28, %v714_v42  ;;  %v1005_v31 = vadd.f32 %v1004_v60, %v874_v50  ;;  %v1008_v10 = vsel %vm498_vm0, %v877_v23, 0.0  ;;  %v3686_v42 = vld [vmem:[#allocation5_spill] sm:$0xff]  ;;  %v3688_v60 = vld [vmem:[#allocation3_spill] sm:$0xff] }
  0xd2   : > { %3682 = vst [vmem:[#allocation55_spill] sm:$0xff] %v2682_v59  ;;  %v715_v2 = vmul.f32 0.0052083335, %v582_v13  ;;  %v586_v0 = vpop.xlane.xlu1 %585  ;;  %v878_v20 = vmul.f32 %v2679_v5, %v2679_v5  ;;  %v879_v61 = vmul.f32 %v2682_v59, %v2682_v59  ;;  %v1009_v27 = vadd.f32 %v1008_v10, %v876_v40 }
  0xd3   : > { %3683 = vst [vmem:[#allocation56_spill] sm:$0xff] %v2686_v39  ;;  %3685 = vst [vmem:[#allocation2_spill] sm:$0xff] %v2689_v51  ;;  %1002 = vadd.xlane.f32.xlu0 %v1001_v55  ;;  %1006 = vadd.xlane.f32.xlu1 %v1005_v31  ;;  %v716_v57 = vmul.f32 0.0052083335, %v586_v0  ;;  %v880_v33 = vmul.f32 %v2686_v39, %v2686_v39  ;;  %v881_v50 = vmul.f32 %v2689_v51, %v2689_v51  ;;  %v3692_v55 = vld [vmem:[#allocation4_spill] sm:$0xff] }
  0xd4   : > { %v2701_v23 = vsub.f32 %v3686_v42, %v715_v2  ;;  %v2704_v28 = vsub.f32 %v3688_v60, %v715_v2  ;;  %v1012_v13 = vsel %vm498_vm0, %v879_v61, 0.0  ;;  %v590_v40 = vpop.xlane.xlu0 %589  ;;  %v3694_v60 = vld [vmem:[#allocation9_spill] sm:$0xff] }
  0xd5   : > { %v2708_v59 = vsub.f32 %v3690_v15, %v716_v57  ;;  %v2711_v0 = vsub.f32 %v3692_v55, %v716_v57  ;;  %v1013_v31 = vadd.f32 %v1012_v13, %v878_v20  ;;  %v1016_v10 = vsel %vm498_vm0, %v881_v50, 0.0  ;;  %v3696_v13 = vld [vmem:[#allocation7_spill] sm:$0xff] }
  0xd6   : > { %3687 = vst [vmem:[#allocation5_spill] sm:$0xff] %v2701_v23  ;;  %3689 = vst [vmem:[#allocation3_spill] sm:$0xff] %v2704_v28  ;;  %v717_v39 = vmul.f32 0.0052083335, %v590_v40  ;;  %v594_v51 = vpop.xlane.xlu1 %593  ;;  %v882_v42 = vmul.f32 %v2701_v23, %v2701_v23  ;;  %v883_v2 = vmul.f32 %v2704_v28, %v2704_v28  ;;  %v1017_v15 = vadd.f32 %v1016_v10, %v880_v33  ;;  %v3698_v23 = vld [vmem:[#allocation10_spill] sm:$0xff] }
  0xd7   : > { %3691 = vst [vmem:[#allocation6_spill] sm:$0xff] %v2708_v59  ;;  %3693 = vst [vmem:[#allocation4_spill] sm:$0xff] %v2711_v0  ;;  %1010 = vadd.xlane.f32.xlu0 %v1009_v27  ;;  %1014 = vadd.xlane.f32.xlu1 %v1013_v31  ;;  %v718_v61 = vmul.f32 0.0052083335, %v594_v51  ;;  %v884_v57 = vmul.f32 %v2708_v59, %v2708_v59  ;;  %v885_v20 = vmul.f32 %v2711_v0, %v2711_v0  ;;  %v3700_v27 = vld [vmem:[#allocation8_spill] sm:$0xff] }
  0xd8   : > { %v2723_v50 = vsub.f32 %v3694_v60, %v717_v39  ;;  %v2726_v55 = vsub.f32 %v3696_v13, %v717_v39  ;;  %v1020_v40 = vsel %vm498_vm0, %v883_v2, 0.0  ;;  %v598_v33 = vpop.xlane.xlu0 %597  ;;  %v3702_v13 = vld [vmem:[#allocation13_spill] sm:$0xff] }
  0xd9   : > { %v2730_v28 = vsub.f32 %v3698_v23, %v718_v61  ;;  %v2733_v51 = vsub.f32 %v3700_v27, %v718_v61  ;;  %v1021_v31 = vadd.f32 %v1020_v40, %v882_v42  ;;  %v1024_v10 = vsel %vm498_vm0, %v885_v20, 0.0  ;;  %v3704_v40 = vld [vmem:[#allocation11_spill] sm:$0xff] }
  0xda   : > { %3695 = vst [vmem:[#allocation9_spill] sm:$0xff] %v2723_v50  ;;  %3697 = vst [vmem:[#allocation7_spill] sm:$0xff] %v2726_v55  ;;  %v719_v59 = vmul.f32 0.0052083335, %v598_v33  ;;  %v602_v0 = vpop.xlane.xlu1 %601  ;;  %v886_v60 = vmul.f32 %v2723_v50, %v2723_v50  ;;  %v887_v39 = vmul.f32 %v2726_v55, %v2726_v55  ;;  %v1025_v23 = vadd.f32 %v1024_v10, %v884_v57  ;;  %v3706_v50 = vld [vmem:[#allocation14_spill] sm:$0xff] }
  0xdb   : > { %3699 = vst [vmem:[#allocation10_spill] sm:$0xff] %v2730_v28  ;;  %3701 = vst [vmem:[#allocation8_spill] sm:$0xff] %v2733_v51  ;;  %1018 = vadd.xlane.f32.xlu0 %v1017_v15  ;;  %1022 = vadd.xlane.f32.xlu1 %v1021_v31  ;;  %v720_v2 = vmul.f32 0.0052083335, %v602_v0  ;;  %v888_v61 = vmul.f32 %v2730_v28, %v2730_v28  ;;  %v889_v42 = vmul.f32 %v2733_v51, %v2733_v51  ;;  %v3708_v15 = vld [vmem:[#allocation12_spill] sm:$0xff] }
  0xdc   : > { %v2745_v20 = vsub.f32 %v3702_v13, %v719_v59  ;;  %v2748_v27 = vsub.f32 %v3704_v40, %v719_v59  ;;  %v1028_v33 = vsel %vm498_vm0, %v887_v39, 0.0  ;;  %v606_v57 = vpop.xlane.xlu0 %605  ;;  %v3710_v40 = vld [vmem:[#allocation17_spill] sm:$0xff] }
  0xdd   : > { %v2752_v55 = vsub.f32 %v3706_v50, %v720_v2  ;;  %v2755_v0 = vsub.f32 %v3708_v15, %v720_v2  ;;  %v1029_v31 = vadd.f32 %v1028_v33, %v886_v60  ;;  %v1032_v10 = vsel %vm498_vm0, %v889_v42, 0.0  ;;  %v3712_v33 = vld [vmem:[#allocation15_spill] sm:$0xff] }
  0xde   : > { %3703 = vst [vmem:[#allocation13_spill] sm:$0xff] %v2745_v20  ;;  %3705 = vst [vmem:[#allocation11_spill] sm:$0xff] %v2748_v27  ;;  %v721_v28 = vmul.f32 0.0052083335, %v606_v57  ;;  %v610_v51 = vpop.xlane.xlu1 %609  ;;  %v890_v13 = vmul.f32 %v2745_v20, %v2745_v20  ;;  %v891_v59 = vmul.f32 %v2748_v27, %v2748_v27  ;;  %v1033_v50 = vadd.f32 %v1032_v10, %v888_v61  ;;  %v3714_v20 = vld [vmem:[#allocation18_spill] sm:$0xff] }
  0xdf   : > { %3707 = vst [vmem:[#allocation14_spill] sm:$0xff] %v2752_v55  ;;  %3709 = vst [vmem:[#allocation12_spill] sm:$0xff] %v2755_v0  ;;  %1026 = vadd.xlane.f32.xlu0 %v1025_v23  ;;  %1030 = vadd.xlane.f32.xlu1 %v1029_v31  ;;  %v722_v39 = vmul.f32 0.0052083335, %v610_v51  ;;  %v892_v2 = vmul.f32 %v2752_v55, %v2752_v55  ;;  %v893_v60 = vmul.f32 %v2755_v0, %v2755_v0  ;;  %v3716_v23 = vld [vmem:[#allocation16_spill] sm:$0xff] }
  0xe0   : > { %v2767_v42 = vsub.f32 %v3710_v40, %v721_v28  ;;  %v2770_v15 = vsub.f32 %v3712_v33, %v721_v28  ;;  %v1036_v57 = vsel %vm498_vm0, %v891_v59, 0.0  ;;  %v614_v61 = vpop.xlane.xlu0 %613  ;;  %v3718_v33 = vld [vmem:[#allocation21_spill] sm:$0xff] }
  0xe1   : > { %v2774_v27 = vsub.f32 %v3714_v20, %v722_v39  ;;  %v2777_v51 = vsub.f32 %v3716_v23, %v722_v39  ;;  %v1037_v31 = vadd.f32 %v1036_v57, %v890_v13  ;;  %v1040_v10 = vsel %vm498_vm0, %v893_v60, 0.0  ;;  %v3720_v57 = vld [vmem:[#allocation19_spill] sm:$0xff] }
  0xe2   : > { %3711 = vst [vmem:[#allocation17_spill] sm:$0xff] %v2767_v42  ;;  %3713 = vst [vmem:[#allocation15_spill] sm:$0xff] %v2770_v15  ;;  %v723_v55 = vmul.f32 0.0052083335, %v614_v61  ;;  %v618_v0 = vpop.xlane.xlu1 %617  ;;  %v894_v40 = vmul.f32 %v2767_v42, %v2767_v42  ;;  %v895_v28 = vmul.f32 %v2770_v15, %v2770_v15  ;;  %v1041_v20 = vadd.f32 %v1040_v10, %v892_v2  ;;  %v3722_v42 = vld [vmem:[#allocation22_spill] sm:$0xff] }
  0xe3   : > { %3715 = vst [vmem:[#allocation18_spill] sm:$0xff] %v2774_v27  ;;  %3717 = vst [vmem:[#allocation16_spill] sm:$0xff] %v2777_v51  ;;  %1034 = vadd.xlane.f32.xlu0 %v1033_v50  ;;  %1038 = vadd.xlane.f32.xlu1 %v1037_v31  ;;  %v724_v59 = vmul.f32 0.0052083335, %v618_v0  ;;  %v896_v39 = vmul.f32 %v2774_v27, %v2774_v27  ;;  %v897_v13 = vmul.f32 %v2777_v51, %v2777_v51  ;;  %v3724_v50 = vld [vmem:[#allocation20_spill] sm:$0xff] }
  0xe4   : > { %v2789_v60 = vsub.f32 %v3718_v33, %v723_v55  ;;  %v2792_v23 = vsub.f32 %v3720_v57, %v723_v55  ;;  %v1044_v61 = vsel %vm498_vm0, %v895_v28, 0.0  ;;  %v622_v2 = vpop.xlane.xlu0 %621  ;;  %v3726_v57 = vld [vmem:[#allocation25_spill] sm:$0xff] }
  0xe5   : > { %v2796_v15 = vsub.f32 %v3722_v42, %v724_v59  ;;  %v2799_v0 = vsub.f32 %v3724_v50, %v724_v59  ;;  %v1045_v31 = vadd.f32 %v1044_v61, %v894_v40  ;;  %v1048_v10 = vsel %vm498_vm0, %v897_v13, 0.0  ;;  %v3728_v61 = vld [vmem:[#allocation23_spill] sm:$0xff] }
  0xe6   : > { %3719 = vst [vmem:[#allocation21_spill] sm:$0xff] %v2789_v60  ;;  %3721 = vst [vmem:[#allocation19_spill] sm:$0xff] %v2792_v23  ;;  %v725_v27 = vmul.f32 0.0052083335, %v622_v2  ;;  %v626_v51 = vpop.xlane.xlu1 %625  ;;  %v898_v33 = vmul.f32 %v2789_v60, %v2789_v60  ;;  %v899_v55 = vmul.f32 %v2792_v23, %v2792_v23  ;;  %v1049_v42 = vadd.f32 %v1048_v10, %v896_v39  ;;  %v3730_v60 = vld [vmem:[#allocation26_spill] sm:$0xff] }
  0xe7   : > { %3723 = vst [vmem:[#allocation22_spill] sm:$0xff] %v2796_v15  ;;  %3725 = vst [vmem:[#allocation20_spill] sm:$0xff] %v2799_v0  ;;  %1042 = vadd.xlane.f32.xlu0 %v1041_v20  ;;  %1046 = vadd.xlane.f32.xlu1 %v1045_v31  ;;  %v726_v28 = vmul.f32 0.0052083335, %v626_v51  ;;  %v900_v59 = vmul.f32 %v2796_v15, %v2796_v15  ;;  %v901_v40 = vmul.f32 %v2799_v0, %v2799_v0  ;;  %v3732_v20 = vld [vmem:[#allocation24_spill] sm:$0xff] }
  0xe8   : > { %v2811_v13 = vsub.f32 %v3726_v57, %v725_v27  ;;  %v2814_v50 = vsub.f32 %v3728_v61, %v725_v27  ;;  %v1052_v2 = vsel %vm498_vm0, %v899_v55, 0.0  ;;  %v630_v39 = vpop.xlane.xlu0 %629  ;;  %v3734_v61 = vld [vmem:[#allocation29_spill] sm:$0xff] }
  0xe9   : > { %v2818_v23 = vsub.f32 %v3730_v60, %v726_v28  ;;  %v2821_v51 = vsub.f32 %v3732_v20, %v726_v28  ;;  %v1053_v31 = vadd.f32 %v1052_v2, %v898_v33  ;;  %v1056_v10 = vsel %vm498_vm0, %v901_v40, 0.0  ;;  %v3736_v2 = vld [vmem:[#allocation27_spill] sm:$0xff] }
  0xea   : > { %3727 = vst [vmem:[#allocation25_spill] sm:$0xff] %v2811_v13  ;;  %3729 = vst [vmem:[#allocation23_spill] sm:$0xff] %v2814_v50  ;;  %v727_v15 = vmul.f32 0.0052083335, %v630_v39  ;;  %v634_v0 = vpop.xlane.xlu1 %633  ;;  %v902_v57 = vmul.f32 %v2811_v13, %v2811_v13  ;;  %v903_v27 = vmul.f32 %v2814_v50, %v2814_v50  ;;  %v1057_v60 = vadd.f32 %v1056_v10, %v900_v59  ;;  %v3738_v13 = vld [vmem:[#allocation30_spill] sm:$0xff] }
  0xeb   : > { %3731 = vst [vmem:[#allocation26_spill] sm:$0xff] %v2818_v23  ;;  %3733 = vst [vmem:[#allocation24_spill] sm:$0xff] %v2821_v51  ;;  %1050 = vadd.xlane.f32.xlu0 %v1049_v42  ;;  %1054 = vadd.xlane.f32.xlu1 %v1053_v31  ;;  %v728_v55 = vmul.f32 0.0052083335, %v634_v0  ;;  %v904_v28 = vmul.f32 %v2818_v23, %v2818_v23  ;;  %v905_v33 = vmul.f32 %v2821_v51, %v2821_v51  ;;  %v3740_v42 = vld [vmem:[#allocation28_spill] sm:$0xff] }
  0xec   : > { %v2833_v40 = vsub.f32 %v3734_v61, %v727_v15  ;;  %v2836_v20 = vsub.f32 %v3736_v2, %v727_v15  ;;  %v1060_v39 = vsel %vm498_vm0, %v903_v27, 0.0  ;;  %v638_v59 = vpop.xlane.xlu0 %637  ;;  %v3742_v2 = vld [vmem:[#allocation33_spill] sm:$0xff] }
  0xed   : > { %v2840_v50 = vsub.f32 %v3738_v13, %v728_v55  ;;  %v2843_v0 = vsub.f32 %v3740_v42, %v728_v55  ;;  %v1061_v31 = vadd.f32 %v1060_v39, %v902_v57  ;;  %v1064_v10 = vsel %vm498_vm0, %v905_v33, 0.0  ;;  %v3744_v39 = vld [vmem:[#allocation31_spill] sm:$0xff] }
  0xee   : > { %3735 = vst [vmem:[#allocation29_spill] sm:$0xff] %v2833_v40  ;;  %3737 = vst [vmem:[#allocation27_spill] sm:$0xff] %v2836_v20  ;;  %v729_v23 = vmul.f32 0.0052083335, %v638_v59  ;;  %v642_v51 = vpop.xlane.xlu1 %641  ;;  %v906_v61 = vmul.f32 %v2833_v40, %v2833_v40  ;;  %v907_v15 = vmul.f32 %v2836_v20, %v2836_v20  ;;  %v1065_v13 = vadd.f32 %v1064_v10, %v904_v28  ;;  %v3746_v40 = vld [vmem:[#allocation34_spill] sm:$0xff] }
  0xef   : > { %3739 = vst [vmem:[#allocation30_spill] sm:$0xff] %v2840_v50  ;;  %3741 = vst [vmem:[#allocation28_spill] sm:$0xff] %v2843_v0  ;;  %1058 = vadd.xlane.f32.xlu0 %v1057_v60  ;;  %1062 = vadd.xlane.f32.xlu1 %v1061_v31  ;;  %v730_v27 = vmul.f32 0.0052083335, %v642_v51  ;;  %v908_v55 = vmul.f32 %v2840_v50, %v2840_v50  ;;  %v909_v57 = vmul.f32 %v2843_v0, %v2843_v0  ;;  %v3748_v60 = vld [vmem:[#allocation32_spill] sm:$0xff] }
  0xf0   : > { %v2855_v33 = vsub.f32 %v3742_v2, %v729_v23  ;;  %v2858_v42 = vsub.f32 %v3744_v39, %v729_v23  ;;  %v1068_v59 = vsel %vm498_vm0, %v907_v15, 0.0  ;;  %v646_v28 = vpop.xlane.xlu0 %645  ;;  %v3750_v39 = vld [vmem:[#allocation37_spill] sm:$0xff] }
  0xf1   : > { %v2862_v20 = vsub.f32 %v3746_v40, %v730_v27  ;;  %v2865_v51 = vsub.f32 %v3748_v60, %v730_v27  ;;  %v1069_v31 = vadd.f32 %v1068_v59, %v906_v61  ;;  %v1072_v10 = vsel %vm498_vm0, %v909_v57, 0.0  ;;  %v3752_v59 = vld [vmem:[#allocation35_spill] sm:$0xff] }
  0xf2   : > { %3743 = vst [vmem:[#allocation33_spill] sm:$0xff] %v2855_v33  ;;  %3745 = vst [vmem:[#allocation31_spill] sm:$0xff] %v2858_v42  ;;  %v731_v50 = vmul.f32 0.0052083335, %v646_v28  ;;  %v650_v0 = vpop.xlane.xlu1 %649  ;;  %v910_v2 = vmul.f32 %v2855_v33, %v2855_v33  ;;  %v911_v23 = vmul.f32 %v2858_v42, %v2858_v42  ;;  %v1073_v40 = vadd.f32 %v1072_v10, %v908_v55  ;;  %v3754_v33 = vld [vmem:[#allocation38_spill] sm:$0xff] }
  0xf3   : > { %3747 = vst [vmem:[#allocation34_spill] sm:$0xff] %v2862_v20  ;;  %3749 = vst [vmem:[#allocation32_spill] sm:$0xff] %v2865_v51  ;;  %1066 = vadd.xlane.f32.xlu0 %v1065_v13  ;;  %1070 = vadd.xlane.f32.xlu1 %v1069_v31  ;;  %v732_v15 = vmul.f32 0.0052083335, %v650_v0  ;;  %v912_v27 = vmul.f32 %v2862_v20, %v2862_v20  ;;  %v913_v61 = vmul.f32 %v2865_v51, %v2865_v51  ;;  %v3756_v13 = vld [vmem:[#allocation36_spill] sm:$0xff] }
  0xf4   : > { %v2877_v57 = vsub.f32 %v3750_v39, %v731_v50  ;;  %v2880_v60 = vsub.f32 %v3752_v59, %v731_v50  ;;  %v1076_v28 = vsel %vm498_vm0, %v911_v23, 0.0  ;;  %v654_v55 = vpop.xlane.xlu0 %653  ;;  %v3758_v59 = vld [vmem:[#allocation41_spill] sm:$0xff] }
  0xf5   : > { %v2884_v42 = vsub.f32 %v3754_v33, %v732_v15  ;;  %v2887_v0 = vsub.f32 %v3756_v13, %v732_v15  ;;  %v1077_v31 = vadd.f32 %v1076_v28, %v910_v2  ;;  %v1080_v10 = vsel %vm498_vm0, %v913_v61, 0.0  ;;  %v3760_v28 = vld [vmem:[#allocation39_spill] sm:$0xff] }
  0xf6   : > { %3751 = vst [vmem:[#allocation37_spill] sm:$0xff] %v2877_v57  ;;  %3753 = vst [vmem:[#allocation35_spill] sm:$0xff] %v2880_v60  ;;  %v733_v20 = vmul.f32 0.0052083335, %v654_v55  ;;  %v658_v51 = vpop.xlane.xlu1 %657  ;;  %v914_v39 = vmul.f32 %v2877_v57, %v2877_v57  ;;  %v915_v50 = vmul.f32 %v2880_v60, %v2880_v60  ;;  %v1081_v33 = vadd.f32 %v1080_v10, %v912_v27  ;;  %v3762_v57 = vld [vmem:[#allocation42_spill] sm:$0xff] }
  0xf7   : > { %3755 = vst [vmem:[#allocation38_spill] sm:$0xff] %v2884_v42  ;;  %3757 = vst [vmem:[#allocation36_spill] sm:$0xff] %v2887_v0  ;;  %1074 = vadd.xlane.f32.xlu0 %v1073_v40  ;;  %1078 = vadd.xlane.f32.xlu1 %v1077_v31  ;;  %v734_v23 = vmul.f32 0.0052083335, %v658_v51  ;;  %v916_v15 = vmul.f32 %v2884_v42, %v2884_v42  ;;  %v917_v2 = vmul.f32 %v2887_v0, %v2887_v0  ;;  %v3764_v40 = vld [vmem:[#allocation40_spill] sm:$0xff] }
  0xf8   : > { %v2899_v61 = vsub.f32 %v3758_v59, %v733_v20  ;;  %v2902_v13 = vsub.f32 %v3760_v28, %v733_v20  ;;  %v1084_v55 = vsel %vm498_vm0, %v915_v50, 0.0  ;;  %v662_v27 = vpop.xlane.xlu0 %661  ;;  %v3766_v28 = vld [vmem:[#allocation45_spill] sm:$0xff] }
  0xf9   : > { %v2906_v60 = vsub.f32 %v3762_v57, %v734_v23  ;;  %v2909_v51 = vsub.f32 %v3764_v40, %v734_v23  ;;  %v1085_v31 = vadd.f32 %v1084_v55, %v914_v39  ;;  %v1088_v10 = vsel %vm498_vm0, %v917_v2, 0.0  ;;  %v3767_v55 = vld [vmem:[#allocation43_spill] sm:$0xff] }
  0xfa   : > { %3759 = vst [vmem:[#allocation41_spill] sm:$0xff] %v2899_v61  ;;  %3761 = vst [vmem:[#allocation39_spill] sm:$0xff] %v2902_v13  ;;  %v735_v42 = vmul.f32 0.0052083335, %v662_v27  ;;  %v666_v0 = vpop.xlane.xlu1 %665  ;;  %v918_v59 = vmul.f32 %v2899_v61, %v2899_v61  ;;  %v919_v20 = vmul.f32 %v2902_v13, %v2902_v13  ;;  %v1089_v57 = vadd.f32 %v1088_v10, %v916_v15  ;;  %v3769_v61 = vld [vmem:[#allocation46_spill] sm:$0xff] }
  0xfb   : > { %3763 = vst [vmem:[#allocation42_spill] sm:$0xff] %v2906_v60  ;;  %3765 = vst [vmem:[#allocation40_spill] sm:$0xff] %v2909_v51  ;;  %1082 = vadd.xlane.f32.xlu0 %v1081_v33  ;;  %1086 = vadd.xlane.f32.xlu1 %v1085_v31  ;;  %v736_v50 = vmul.f32 0.0052083335, %v666_v0  ;;  %v920_v23 = vmul.f32 %v2906_v60, %v2906_v60  ;;  %v921_v39 = vmul.f32 %v2909_v51, %v2909_v51  ;;  %v3771_v33 = vld [vmem:[#allocation44_spill] sm:$0xff] }
  0xfc   : > { %v2921_v2 = vsub.f32 %v3766_v28, %v735_v42  ;;  %v2924_v40 = vsub.f32 %v3767_v55, %v735_v42  ;;  %v1092_v27 = vsel %vm498_vm0, %v919_v20, 0.0  ;;  %v670_v15 = vpop.xlane.xlu0 %669  ;;  %v3773_v55 = vld [vmem:[#allocation47_spill] sm:$0xff] }
  0xfd   : > { %v2928_v13 = vsub.f32 %v3769_v61, %v736_v50  ;;  %v2931_v0 = vsub.f32 %v3771_v33, %v736_v50  ;;  %v1093_v31 = vadd.f32 %v1092_v27, %v918_v59  ;;  %v1096_v10 = vsel %vm498_vm0, %v921_v39, 0.0 }
  0xfe   : > { %3768 = vst [vmem:[#allocation45_spill] sm:$0xff] %v2924_v40  ;;  %v737_v60 = vmul.f32 0.0052083335, %v670_v15  ;;  %v674_v51 = vpop.xlane.xlu1 %673  ;;  %v922_v28 = vmul.f32 %v2921_v2, %v2921_v2  ;;  %v923_v42 = vmul.f32 %v2924_v40, %v2924_v40  ;;  %v1097_v61 = vadd.f32 %v1096_v10, %v920_v23  ;;  %v3774_v15 = vld [vmem:[#allocation49_spill] sm:$0xff] }
  0xff   : > { %3770 = vst [vmem:[#allocation43_spill] sm:$0xff] %v2928_v13  ;;  %3772 = vst [vmem:[#allocation46_spill] sm:$0xff] %v2931_v0  ;;  %1090 = vadd.xlane.f32.xlu0 %v1089_v57  ;;  %1094 = vadd.xlane.f32.xlu1 %v1093_v31  ;;  %v738_v20 = vmul.f32 0.0052083335, %v674_v51  ;;  %v924_v50 = vmul.f32 %v2928_v13, %v2928_v13  ;;  %v925_v59 = vmul.f32 %v2931_v0, %v2931_v0  ;;  %v3776_v57 = vld [vmem:[#allocation48_spill] sm:$0xff] }
 0x100   : > { %v2943_v39 = vsub.f32 %v2420_v34, %v737_v60  ;;  %v2946_v27 = vsub.f32 %v3773_v55, %v737_v60  ;;  %v1100_v33 = vsel %vm498_vm0, %v923_v42, 0.0  ;;  %v678_v23 = vpop.xlane.xlu0 %677 }
 0x101   : > { %v2950_v40 = vsub.f32 %v3774_v15, %v738_v20  ;;  %v2953_v51 = vsub.f32 %v3776_v57, %v738_v20  ;;  %v1101_v31 = vadd.f32 %v1100_v33, %v922_v28  ;;  %v1104_v10 = vsel %vm498_vm0, %v925_v59, 0.0  ;;  %v3778_v33 = vld [vmem:[#allocation50_spill] sm:$0xff] }
 0x102   : > { %v739_v13 = vmul.f32 0.0052083335, %v678_v23  ;;  %v682_v0 = vpop.xlane.xlu1 %681  ;;  %v926_v34 = vmul.f32 %v2943_v39, %v2943_v39  ;;  %v927_v60 = vmul.f32 %v2946_v27, %v2946_v27  ;;  %v1105_v55 = vadd.f32 %v1104_v10, %v924_v50 }
 0x103   : > { %3775 = vst [vmem:[#allocation44_spill] sm:$0xff] %v2950_v40  ;;  %3777 = vst [vmem:[#allocation47_spill] sm:$0xff] %v2953_v51  ;;  %1098 = vadd.xlane.f32.xlu0 %v1097_v61  ;;  %1102 = vadd.xlane.f32.xlu1 %v1101_v31  ;;  %v740_v42 = vmul.f32 0.0052083335, %v682_v0  ;;  %v928_v20 = vmul.f32 %v2950_v40, %v2950_v40  ;;  %v929_v28 = vmul.f32 %v2953_v51, %v2953_v51  ;;  %v3779_v61 = vld [vmem:[#allocation51_spill] sm:$0xff] }
 0x104   : > { %v2965_v59 = vsub.f32 %v2442_v58, %v739_v13  ;;  %v2968_v15 = vsub.f32 %v3778_v33, %v739_v13  ;;  %v1108_v57 = vsel %vm498_vm0, %v927_v60, 0.0  ;;  %v686_v50 = vpop.xlane.xlu0 %685 }
 0x105   : > { %v2972_v23 = vsub.f32 %v2447_v62, %v740_v42  ;;  %v2975_v0 = vsub.f32 %v3779_v61, %v740_v42  ;;  %v1109_v31 = vadd.f32 %v1108_v57, %v926_v34  ;;  %v1112_v10 = vsel %vm498_vm0, %v929_v28, 0.0 }
 0x106   : > { %v741_v40 = vmul.f32 0.0052083335, %v686_v50  ;;  %v690_v51 = vpop.xlane.xlu1 %689  ;;  %v930_v58 = vmul.f32 %v2965_v59, %v2965_v59  ;;  %v931_v13 = vmul.f32 %v2968_v15, %v2968_v15  ;;  %v1113_v62 = vadd.f32 %v1112_v10, %v928_v20 }
 0x107   : > { %1106 = vadd.xlane.f32.xlu0 %v1105_v55  ;;  %1110 = vadd.xlane.f32.xlu1 %v1109_v31  ;;  %v742_v60 = vmul.f32 0.0052083335, %v690_v51  ;;  %v932_v42 = vmul.f32 %v2972_v23, %v2972_v23  ;;  %v933_v34 = vmul.f32 %v2975_v0, %v2975_v0 }
 0x108   : > { %v2987_v28 = vsub.f32 %v2462_v38, %v741_v40  ;;  %v2990_v33 = vsub.f32 %v2451_v9, %v741_v40  ;;  %v1116_v57 = vsel %vm498_vm0, %v931_v13, 0.0  ;;  %v694_v55 = vpop.xlane.xlu0 %693 }
 0x109   : > { %v2994_v61 = vsub.f32 %v2467_v53, %v742_v60  ;;  %v2997_v51 = vsub.f32 %v2457_v21, %v742_v60  ;;  %v1117_v20 = vadd.f32 %v1116_v57, %v930_v58  ;;  %v1120_v50 = vsel %vm498_vm0, %v933_v34, 0.0 }
 0x10a   : > { %v743_v31 = vmul.f32 0.0052083335, %v694_v55  ;;  %v934_v38 = vmul.f32 %v2987_v28, %v2987_v28  ;;  %v935_v9 = vmul.f32 %v2990_v33, %v2990_v33  ;;  %v1121_v40 = vadd.f32 %v1120_v50, %v932_v42 }
 0x10b   : > { %3780 = vst [vmem:[#allocation49_spill] sm:$0xff] %v2994_v61  ;;  %3781 = vst [vmem:[#allocation48_spill] sm:$0xff] %v2997_v51  ;;  %1114 = vadd.xlane.f32.xlu0 %v1113_v62  ;;  %1118 = vadd.xlane.f32.xlu1 %v1117_v20  ;;  %v936_v53 = vmul.f32 %v2994_v61, %v2994_v61  ;;  %v937_v21 = vmul.f32 %v2997_v51, %v2997_v51  ;;  %v1385_v50 = vlaneseq }
 0x10c   : > { %v3009_v10 = vsub.f32 %v2476_v49, %v743_v31  ;;  %v3012_v58 = vsub.f32 %v2471_v37, %v743_v31  ;;  %v1124_v13 = vsel %vm498_vm0, %v935_v9, 0.0 }
 0x10d   : > { %v1125_v60 = vadd.f32 %v1124_v13, %v934_v38  ;;  %v1128_v34 = vsel %vm498_vm0, %v937_v21, 0.0  ;;  %v1386_v51 = vshrl.u32 %v1385_v50, 7 }
 0x10e   : > { %3782 = vst [vmem:[#allocation50_spill] sm:$0xff] %v3012_v58  ;;  %v938_v62 = vmul.f32 %v3009_v10, %v3009_v10  ;;  %v939_v42 = vmul.f32 %v3012_v58, %v3012_v58  ;;  %v1129_v57 = vadd.f32 %v1128_v34, %v936_v53 }
 0x10f   : > { %1122 = vadd.xlane.f32.xlu0 %v1121_v40  ;;  %1126 = vadd.xlane.f32.xlu1 %v1125_v60 }
 0x110   : > { %v1132_v49 = vsel %vm498_vm0, %v939_v42, 0.0  ;;  %v1387_v42 = vsub.s32 0, %v1386_v51 }
 0x111   : > { %v1133_v55 = vadd.f32 %v1132_v49, %v938_v62  ;;  %v1283_v62 = vld [vmem:[%s3523_s2] ss:$2 sm:$0x3] }
 0x113   : > { %1130 = vadd.xlane.f32.xlu0 %v1129_v57  ;;  %1134 = vadd.xlane.f32.xlu1 %v1133_v55  ;;  %v1391_v57 = vsub.s32 1, %v1386_v51 }
 0x140   : > { %v943_v37 = vpop.xlane.xlu1 %942 }
 0x141   : > { %v1136_v20 = vmul.f32 0.0052083335, %v943_v37  ;;  %v1781_v37 = vld [vmem:[%s3523_s2 + $0x1] ss:$2 sm:$0x3] }
 0x143   : > { %v1185_v31 = vadd.f32 1e-05, %v1136_v20 }
 0x144   : > { %v951_v38 = vpop.xlane.xlu1 %950  ;;  %v947_v9 = vpop.xlane.xlu0 %946 }
 0x145   : > { %1795 = vrsqrt.f32 %v1185_v31  ;;  %v1138_v21 = vmul.f32 0.0052083335, %v951_v38  ;;  %v1137_v13 = vmul.f32 0.0052083335, %v947_v9  ;;  %v3027_v38 = vrot.slane %v1283_v62, %v1387_v42 }
 0x146   : > { %v3029_v9 = vrot.slane %v1283_v62, %v1391_v57 }
 0x147   : > { %v1187_v61 = vadd.f32 1e-05, %v1138_v21  ;;  %v1186_v58 = vadd.f32 1e-05, %v1137_v13  ;;  %v3031_v13 = vrot.slane %v1781_v37, %v1387_v42 }
 0x148   : > { %v959_v40 = vpop.xlane.xlu1 %958  ;;  %v955_v60 = vpop.xlane.xlu0 %954 }
 0x149   : > { %1797 = vrsqrt.f32 %v1187_v61  ;;  %v1140_v53 = vmul.f32 0.0052083335, %v959_v40  ;;  %v1139_v34 = vmul.f32 0.0052083335, %v955_v60  ;;  %v3033_v40 = vrot.slane %v1781_v37, %v1391_v57 }
 0x14a   : > { %1799 = vrsqrt.f32 %v1186_v58 }
 0x14b   : > { %v1189_v49 = vadd.f32 1e-05, %v1140_v53  ;;  %v1188_v55 = vadd.f32 1e-05, %v1139_v34 }
 0x14c   : > { %v967_v20 = vpop.xlane.xlu1 %966  ;;  %v963_v50 = vpop.xlane.xlu0 %962 }
 0x14d   : > { %1801 = vrsqrt.f32 %v1189_v49  ;;  %v1142_v31 = vmul.f32 0.0052083335, %v967_v20  ;;  %v1141_v61 = vmul.f32 0.0052083335, %v963_v50 }
 0x14e   : > { %1803 = vrsqrt.f32 %v1188_v55 }
 0x14f   : > { %v1796_v21 = vpop.eup %1795  ;;  %v1191_v51 = vadd.f32 1e-05, %v1142_v31  ;;  %v1190_v58 = vadd.f32 1e-05, %v1141_v61 }
 0x150   : > { %v1286_v60 = vmul.f32 %v1796_v21, %v2483_v24  ;;  %v1287_v53 = vmul.f32 %v1796_v21, %v2486_v32  ;;  %v975_v34 = vpop.xlane.xlu1 %974  ;;  %v971_v49 = vpop.xlane.xlu0 %970 }
 0x151   : > { %1805 = vrsqrt.f32 %v1191_v51  ;;  %v1144_v20 = vmul.f32 0.0052083335, %v975_v34  ;;  %v1143_v50 = vmul.f32 0.0052083335, %v971_v49 }
 0x152   : > { %v1395_v62 = vmul.f32 %v3027_v38, %v1286_v60  ;;  %v1396_v55 = vmul.f32 %v3029_v9, %v1287_v53  ;;  %1807 = vrsqrt.f32 %v1190_v58 }
 0x153   : > { %v1798_v31 = vpop.eup %1797  ;;  %v1193_v24 = vadd.f32 1e-05, %v1144_v20  ;;  %v1192_v32 = vadd.f32 1e-05, %v1143_v50 }
 0x154   : > { %v1800_v42 = vpop.eup %1799  ;;  %v1504_v57 = vadd.f32 %v3031_v13, %v1395_v62  ;;  %v1505_v37 = vadd.f32 %v3033_v40, %v1396_v55  ;;  %v1290_v61 = vmul.f32 %v1798_v31, %v2489_v46  ;;  %v1291_v21 = vmul.f32 %v1798_v31, %v2492_v16  ;;  %v983_v51 = vpop.xlane.xlu1 %982 }
 0x155   : > { %v979_v58 = vpop.xlane.xlu0 %978  ;;  %v1288_v60 = vmul.f32 %v1800_v42, %v2503_v54  ;;  %v1289_v53 = vmul.f32 %v1800_v42, %v2506_v12  ;;  %1809 = vrsqrt.f32 %v1193_v24  ;;  %v1146_v34 = vmul.f32 0.0052083335, %v983_v51  ;;  %v3783_v51 = vld [vmem:[#allocation52_spill] sm:$0xff] }
 0x156   : > { %1602 = vst [vmem:[%s3043_s28] sm:$0xff] %v1504_v57  ;;  %1603 = vst.msk [vmem:[%s3043_s28 + $0x8] sm:$0xff] %vm498_vm0, %v1505_v37  ;;  %v1399_v49 = vmul.f32 %v3027_v38, %v1290_v61  ;;  %v1400_v20 = vmul.f32 %v3029_v9, %v1291_v21  ;;  %1811 = vrsqrt.f32 %v1192_v32  ;;  %v1145_v50 = vmul.f32 0.0052083335, %v979_v58 }
 0x157   : > { %v1802_v46 = vpop.eup %1801  ;;  %v1397_v16 = vmul.f32 %v3027_v38, %v1288_v60  ;;  %v1398_v54 = vmul.f32 %v3029_v9, %v1289_v53  ;;  %v1195_v62 = vadd.f32 1e-05, %v1146_v34 }
 0x158   : > { %v1804_v12 = vpop.eup %1803  ;;  %v1508_v55 = vadd.f32 %v3031_v13, %v1399_v49  ;;  %v1509_v31 = vadd.f32 %v3033_v40, %v1400_v20  ;;  %v1294_v24 = vmul.f32 %v1802_v46, %v2525_v48  ;;  %v1295_v32 = vmul.f32 %v1802_v46, %v2528_v4  ;;  %v991_v42 = vpop.xlane.xlu1 %990 }
 0x159   : > { %v987_v57 = vpop.xlane.xlu0 %986  ;;  %v1506_v37 = vadd.f32 %v3031_v13, %v1397_v16  ;;  %v1507_v61 = vadd.f32 %v3033_v40, %v1398_v54  ;;  %v1292_v21 = vmul.f32 %v1804_v12, %v2510_v6  ;;  %v1293_v58 = vmul.f32 %v1804_v12, %v3783_v51 }
 0x15a   : > { %1606 = vst [vmem:[%s3043_s28 + $0x20] sm:$0xff] %v1508_v55  ;;  %1607 = vst.msk [vmem:[%s3043_s28 + $0x28] sm:$0xff] %vm498_vm0, %v1509_v31  ;;  %v1403_v60 = vmul.f32 %v3027_v38, %v1294_v24  ;;  %v1404_v48 = vmul.f32 %v3029_v9, %v1295_v32  ;;  %1813 = vrsqrt.f32 %v1195_v62  ;;  %v1194_v53 = vadd.f32 1e-05, %v1145_v50 }
 0x15b   : > { %v1806_v4 = vpop.eup %1805  ;;  %1604 = vst [vmem:[%s3043_s28 + $0x10] sm:$0xff] %v1506_v37  ;;  %1605 = vst.msk [vmem:[%s3043_s28 + $0x18] sm:$0xff] %vm498_vm0, %v1507_v61  ;;  %v1401_v34 = vmul.f32 %v3027_v38, %v1292_v21  ;;  %v1402_v6 = vmul.f32 %v3029_v9, %v1293_v58  ;;  %v1148_v49 = vmul.f32 0.0052083335, %v991_v42  ;;  %v1147_v20 = vmul.f32 0.0052083335, %v987_v57 }
 0x15c   : > { %v1808_v46 = vpop.eup %1807  ;;  %v1512_v16 = vadd.f32 %v3031_v13, %v1403_v60  ;;  %v1513_v54 = vadd.f32 %v3033_v40, %v1404_v48  ;;  %v1298_v50 = vmul.f32 %v1806_v4, %v2547_v18  ;;  %v1299_v62 = vmul.f32 %v1806_v4, %v2550_v45  ;;  %v999_v12 = vpop.xlane.xlu1 %998 }
 0x15d   : > { %v995_v55 = vpop.xlane.xlu0 %994  ;;  %v1510_v31 = vadd.f32 %v3031_v13, %v1401_v34  ;;  %v1511_v24 = vadd.f32 %v3033_v40, %v1402_v6  ;;  %v1296_v32 = vmul.f32 %v1808_v46, %v2532_v3  ;;  %v1297_v42 = vmul.f32 %v1808_v46, %v2535_v14 }
 0x15e   : > { %1610 = vst [vmem:[%s3043_s28 + $0x40] sm:$0xff] %v1512_v16  ;;  %1611 = vst.msk [vmem:[%s3043_s28 + $0x48] sm:$0xff] %vm498_vm0, %v1513_v54  ;;  %v1407_v57 = vmul.f32 %v3027_v38, %v1298_v50  ;;  %v1408_v18 = vmul.f32 %v3029_v9, %v1299_v62  ;;  %1815 = vrsqrt.f32 %v1194_v53  ;;  %v1197_v37 = vadd.f32 1e-05, %v1148_v49 }
 0x15f   : > { %v1810_v45 = vpop.eup %1809  ;;  %1608 = vst [vmem:[%s3043_s28 + $0x30] sm:$0xff] %v1510_v31  ;;  %1609 = vst.msk [vmem:[%s3043_s28 + $0x38] sm:$0xff] %vm498_vm0, %v1511_v24  ;;  %v1405_v61 = vmul.f32 %v3027_v38, %v1296_v32  ;;  %v1406_v3 = vmul.f32 %v3029_v9, %v1297_v42  ;;  %v1196_v14 = vadd.f32 1e-05, %v1147_v20  ;;  %v1150_v21 = vmul.f32 0.0052083335, %v999_v12 }
 0x160   : > { %v1812_v51 = vpop.eup %1811  ;;  %v1516_v58 = vadd.f32 %v3031_v13, %v1407_v57  ;;  %v1517_v60 = vadd.f32 %v3033_v40, %v1408_v18  ;;  %v1302_v48 = vmul.f32 %v1810_v45, %v2569_v36  ;;  %v1303_v53 = vmul.f32 %v1810_v45, %v2572_v29  ;;  %v1007_v4 = vpop.xlane.xlu1 %1006 }
 0x161   : > { %v1003_v34 = vpop.xlane.xlu0 %1002  ;;  %v1514_v6 = vadd.f32 %v3031_v13, %v1405_v61  ;;  %v1515_v49 = vadd.f32 %v3033_v40, %v1406_v3  ;;  %v1300_v20 = vmul.f32 %v1812_v51, %v2554_v11  ;;  %v1301_v46 = vmul.f32 %v1812_v51, %v2557_v8 }
 0x162   : > { %1614 = vst [vmem:[%s3043_s28 + $0x60] sm:$0xff] %v1516_v58  ;;  %1615 = vst.msk [vmem:[%s3043_s28 + $0x68] sm:$0xff] %vm498_vm0, %v1517_v60  ;;  %v1411_v16 = vmul.f32 %v3027_v38, %v1302_v48  ;;  %v1412_v54 = vmul.f32 %v3029_v9, %v1303_v53  ;;  %1817 = vrsqrt.f32 %v1197_v37  ;;  %v1199_v36 = vadd.f32 1e-05, %v1150_v21 }
 0x163   : > { %1612 = vst [vmem:[%s3043_s28 + $0x50] sm:$0xff] %v1514_v6  ;;  %1613 = vst.msk [vmem:[%s3043_s28 + $0x58] sm:$0xff] %vm498_vm0, %v1515_v49  ;;  %v1409_v29 = vmul.f32 %v3027_v38, %v1300_v20  ;;  %v1410_v11 = vmul.f32 %v3029_v9, %v1301_v46  ;;  %1819 = vrsqrt.f32 %v1196_v14  ;;  %v1149_v8 = vmul.f32 0.0052083335, %v995_v55 }
 0x164   : > { %v1814_v50 = vpop.eup %1813  ;;  %v1520_v62 = vadd.f32 %v3031_v13, %v1411_v16  ;;  %v1521_v12 = vadd.f32 %v3033_v40, %v1412_v54  ;;  %1821 = vrsqrt.f32 %v1199_v36  ;;  %v1152_v31 = vmul.f32 0.0052083335, %v1007_v4  ;;  %v1015_v24 = vpop.xlane.xlu1 %1014 }
 0x165   : > { %v1011_v32 = vpop.xlane.xlu0 %1010  ;;  %v1518_v42 = vadd.f32 %v3031_v13, %v1409_v29  ;;  %v1519_v57 = vadd.f32 %v3033_v40, %v1410_v11  ;;  %v1306_v18 = vmul.f32 %v1814_v50, %v2591_v52  ;;  %v1307_v37 = vmul.f32 %v1814_v50, %v2594_v43 }
 0x166   : > { %1618 = vst [vmem:[%s3043_s28 + $0x80] sm:$0xff] %v1520_v62  ;;  %1619 = vst.msk [vmem:[%s3043_s28 + $0x88] sm:$0xff] %vm498_vm0, %v1521_v12  ;;  %v1198_v55 = vadd.f32 1e-05, %v1149_v8  ;;  %v1201_v45 = vadd.f32 1e-05, %v1152_v31 }
 0x167   : > { %v1151_v61 = vmul.f32 0.0052083335, %v1003_v34  ;;  %1616 = vst [vmem:[%s3043_s28 + $0x70] sm:$0xff] %v1518_v42  ;;  %1617 = vst.msk [vmem:[%s3043_s28 + $0x78] sm:$0xff] %vm498_vm0, %v1519_v57  ;;  %v1415_v3 = vmul.f32 %v3027_v38, %v1306_v18  ;;  %v1416_v14 = vmul.f32 %v3029_v9, %v1307_v37  ;;  %v1154_v21 = vmul.f32 0.0052083335, %v1015_v24 }
 0x168   : > { %v1153_v51 = vmul.f32 0.0052083335, %v1011_v32  ;;  %v1816_v52 = vpop.eup %1815  ;;  %1823 = vrsqrt.f32 %v1198_v55  ;;  %v1023_v58 = vpop.xlane.xlu1 %1022 }
 0x169   : > { %v1200_v43 = vadd.f32 1e-05, %v1151_v61  ;;  %v1019_v60 = vpop.xlane.xlu0 %1018  ;;  %v1524_v48 = vadd.f32 %v3031_v13, %v1415_v3  ;;  %v1525_v53 = vadd.f32 %v3033_v40, %v1416_v14  ;;  %v1304_v4 = vmul.f32 %v1816_v52, %v2576_v30 }
 0x16a   : > { %v1305_v34 = vmul.f32 %v1816_v52, %v2579_v41  ;;  %1825 = vrsqrt.f32 %v1201_v45  ;;  %v1203_v6 = vadd.f32 1e-05, %v1154_v21  ;;  %v1202_v49 = vadd.f32 1e-05, %v1153_v51 }
 0x16b   : > { %v1156_v20 = vmul.f32 0.0052083335, %v1023_v58  ;;  %1622 = vst [vmem:[%s3043_s28 + $0xa0] sm:$0xff] %v1524_v48  ;;  %1623 = vst.msk [vmem:[%s3043_s28 + $0xa8] sm:$0xff] %vm498_vm0, %v1525_v53  ;;  %v1413_v46 = vmul.f32 %v3027_v38, %v1304_v4  ;;  %1827 = vrsqrt.f32 %v1200_v43  ;;  %v1155_v54 = vmul.f32 0.0052083335, %v1019_v60 }
 0x16c   : > { %v1414_v16 = vmul.f32 %v3029_v9, %v1305_v34  ;;  %v1818_v36 = vpop.eup %1817  ;;  %1829 = vrsqrt.f32 %v1203_v6  ;;  %v1031_v29 = vpop.xlane.xlu1 %1030 }
 0x16d   : > { %v1205_v30 = vadd.f32 1e-05, %v1156_v20  ;;  %v1027_v41 = vpop.xlane.xlu0 %1026  ;;  %v1820_v11 = vpop.eup %1819  ;;  %v1522_v8 = vadd.f32 %v3031_v13, %v1413_v46  ;;  %v1310_v62 = vmul.f32 %v1818_v36, %v2613_v1  ;;  %v1311_v12 = vmul.f32 %v1818_v36, %v2616_v19 }
 0x16e   : > { %v1523_v50 = vadd.f32 %v3033_v40, %v1414_v16  ;;  %v1822_v31 = vpop.eup %1821  ;;  %v1308_v24 = vmul.f32 %v1820_v11, %v2598_v17  ;;  %v1309_v32 = vmul.f32 %v1820_v11, %v2601_v63  ;;  %1831 = vrsqrt.f32 %v1202_v49 }
 0x16f   : > { %v1204_v42 = vadd.f32 1e-05, %v1155_v54  ;;  %1620 = vst [vmem:[%s3043_s28 + $0x90] sm:$0xff] %v1522_v8  ;;  %v1419_v57 = vmul.f32 %v3027_v38, %v1310_v62  ;;  %v1420_v18 = vmul.f32 %v3029_v9, %v1311_v12  ;;  %v1314_v37 = vmul.f32 %v1822_v31, %v2635_v26 }
 0x170   : > { %1621 = vst.msk [vmem:[%s3043_s28 + $0x98] sm:$0xff] %vm498_vm0, %v1523_v50  ;;  %v1315_v1 = vmul.f32 %v1822_v31, %v2638_v7  ;;  %v1417_v19 = vmul.f32 %v3027_v38, %v1308_v24  ;;  %v1418_v17 = vmul.f32 %v3029_v9, %v1309_v32  ;;  %1833 = vrsqrt.f32 %v1205_v30  ;;  %v1039_v55 = vpop.xlane.xlu1 %1038  ;;  %v3784_v24 = vld [vmem:[#allocation55_spill] sm:$0xff] }
 0x171   : > { %v1158_v63 = vmul.f32 0.0052083335, %v1031_v29  ;;  %v1035_v45 = vpop.xlane.xlu0 %1034  ;;  %v1528_v61 = vadd.f32 %v3031_v13, %v1419_v57  ;;  %v1529_v3 = vadd.f32 %v3033_v40, %v1420_v18  ;;  %v1423_v26 = vmul.f32 %v3027_v38, %v1314_v37  ;;  %v3785_v37 = vld [vmem:[#allocation53_spill] sm:$0xff] }
 0x172   : > { %v1424_v7 = vmul.f32 %v3029_v9, %v1315_v1  ;;  %v1824_v14 = vpop.eup %1823  ;;  %v1526_v21 = vadd.f32 %v3031_v13, %v1417_v19  ;;  %v1527_v51 = vadd.f32 %v3033_v40, %v1418_v17  ;;  %1835 = vrsqrt.f32 %v1204_v42  ;;  %v3786_v19 = vld [vmem:[#allocation54_spill] sm:$0xff] }
 0x173   : > { %v1207_v52 = vadd.f32 1e-05, %v1158_v63  ;;  %1626 = vst [vmem:[%s3043_s28 + $0xc0] sm:$0xff] %v1528_v61  ;;  %1627 = vst.msk [vmem:[%s3043_s28 + $0xc8] sm:$0xff] %vm498_vm0, %v1529_v3  ;;  %v1532_v43 = vadd.f32 %v3031_v13, %v1423_v26  ;;  %v1312_v60 = vmul.f32 %v1824_v14, %v2620_v35  ;;  %v1313_v48 = vmul.f32 %v1824_v14, %v2623_v22 }
 0x174   : > { %v1533_v58 = vadd.f32 %v3033_v40, %v1424_v7  ;;  %v1826_v53 = vpop.eup %1825  ;;  %1624 = vst [vmem:[%s3043_s28 + $0xb0] sm:$0xff] %v1526_v21  ;;  %1625 = vst.msk [vmem:[%s3043_s28 + $0xb8] sm:$0xff] %vm498_vm0, %v1527_v51  ;;  %v1157_v4 = vmul.f32 0.0052083335, %v1027_v41  ;;  %v1160_v34 = vmul.f32 0.0052083335, %v1039_v55  ;;  %v1047_v49 = vpop.xlane.xlu1 %1046 }
 0x175   : > { %1837 = vrsqrt.f32 %v1207_v52  ;;  %v1159_v6 = vmul.f32 0.0052083335, %v1035_v45  ;;  %v3166_v20 = vpop.xlane.xlu0 %1042  ;;  %v1828_v46 = vpop.eup %1827  ;;  %1630 = vst [vmem:[%s3043_s28 + $0xe0] sm:$0xff] %v1532_v43  ;;  %v1421_v16 = vmul.f32 %v3027_v38, %v1312_v60  ;;  %v1422_v35 = vmul.f32 %v3029_v9, %v1313_v48  ;;  %v3787_v7 = vld [vmem:[#allocation5_spill] sm:$0xff]  ;;  %v3788_v21 = vld [vmem:[#allocation3_spill] sm:$0xff] }
 0x176   : > { %1631 = vst.msk [vmem:[%s3043_s28 + $0xe8] sm:$0xff] %vm498_vm0, %v1533_v58  ;;  %v1318_v22 = vmul.f32 %v1826_v53, %v2657_v47  ;;  %v1319_v54 = vmul.f32 %v1826_v53, %v2660_v25  ;;  %v1830_v36 = vpop.eup %1829  ;;  %v1316_v30 = vmul.f32 %v1828_v46, %v2642_v56  ;;  %v1317_v29 = vmul.f32 %v1828_v46, %v2645_v44 }
 0x177   : > { %v1206_v41 = vadd.f32 1e-05, %v1157_v4  ;;  %v1209_v11 = vadd.f32 1e-05, %v1160_v34  ;;  %v1530_v8 = vadd.f32 %v3031_v13, %v1421_v16  ;;  %v1531_v50 = vadd.f32 %v3033_v40, %v1422_v35 }
 0x178   : > { %v1427_v62 = vmul.f32 %v3027_v38, %v1318_v22  ;;  %v1428_v12 = vmul.f32 %v3029_v9, %v1319_v54  ;;  %v1832_v47 = vpop.eup %1831  ;;  %v1425_v25 = vmul.f32 %v3027_v38, %v1316_v30  ;;  %v1426_v31 = vmul.f32 %v3029_v9, %v1317_v29  ;;  %v1055_v32 = vpop.xlane.xlu1 %1054  ;;  %v3789_v22 = vld [vmem:[#allocation56_spill] sm:$0xff] }
 0x179   : > { %v1322_v56 = vmul.f32 %v1830_v36, %v2679_v5  ;;  %v1323_v44 = vmul.f32 %v1830_v36, %v3784_v24  ;;  %v1051_v42 = vpop.xlane.xlu0 %1050  ;;  %1628 = vst [vmem:[%s3043_s28 + $0xd0] sm:$0xff] %v1530_v8  ;;  %1629 = vst.msk [vmem:[%s3043_s28 + $0xd8] sm:$0xff] %vm498_vm0, %v1531_v50  ;;  %v1320_v1 = vmul.f32 %v1832_v47, %v3785_v37  ;;  %1839 = vrsqrt.f32 %v1206_v41  ;;  %v3790_v36 = vld [vmem:[#allocation2_spill] sm:$0xff]  ;;  %v3791_v8 = vld [vmem:[#allocation9_spill] sm:$0xff] }
 0x17a   : > { %v1536_v57 = vadd.f32 %v3031_v13, %v1427_v62  ;;  %v1537_v18 = vadd.f32 %v3033_v40, %v1428_v12  ;;  %v1321_v17 = vmul.f32 %v1832_v47, %v3786_v19  ;;  %v1834_v63 = vpop.eup %1833  ;;  %v1534_v5 = vadd.f32 %v3031_v13, %v1425_v25  ;;  %v3792_v62 = vld [vmem:[#allocation7_spill] sm:$0xff] }
 0x17b   : > { %v1535_v55 = vadd.f32 %v3033_v40, %v1426_v31  ;;  %v1431_v45 = vmul.f32 %v3027_v38, %v1322_v56  ;;  %v1432_v61 = vmul.f32 %v3029_v9, %v1323_v44  ;;  %v1429_v3 = vmul.f32 %v3027_v38, %v1320_v1 }
 0x17c   : > { %1634 = vst [vmem:[%s3043_s28 + $0x100] sm:$0xff] %v1536_v57  ;;  %1635 = vst.msk [vmem:[%s3043_s28 + $0x108] sm:$0xff] %vm498_vm0, %v1537_v18  ;;  %v1430_v26 = vmul.f32 %v3029_v9, %v1321_v17  ;;  %v1326_v14 = vmul.f32 %v1834_v63, %v3787_v7  ;;  %v1327_v51 = vmul.f32 %v1834_v63, %v3788_v21  ;;  %v1836_v52 = vpop.eup %1835  ;;  %v1208_v60 = vadd.f32 1e-05, %v1159_v6  ;;  %v1063_v48 = vpop.xlane.xlu1 %1062 }
 0x17d   : > { %1632 = vst [vmem:[%s3043_s28 + $0xf0] sm:$0xff] %v1534_v5  ;;  %1633 = vst.msk [vmem:[%s3043_s28 + $0xf8] sm:$0xff] %vm498_vm0, %v1535_v55  ;;  %v1540_v43 = vadd.f32 %v3031_v13, %v1431_v45  ;;  %v1541_v58 = vadd.f32 %v3033_v40, %v1432_v61  ;;  %v1059_v53 = vpop.xlane.xlu0 %1058  ;;  %v1538_v4 = vadd.f32 %v3031_v13, %v1429_v3  ;;  %1841 = vrsqrt.f32 %v1209_v11 }
 0x17e   : > { %v1539_v34 = vadd.f32 %v3033_v40, %v1430_v26  ;;  %v1435_v46 = vmul.f32 %v3027_v38, %v1326_v14  ;;  %v1436_v16 = vmul.f32 %v3029_v9, %v1327_v51  ;;  %v1324_v54 = vmul.f32 %v1836_v52, %v3789_v22 }
 0x17f   : > { %v1838_v35 = vpop.eup %1837  ;;  %1638 = vst [vmem:[%s3043_s28 + $0x120] sm:$0xff] %v1540_v43  ;;  %1639 = vst.msk [vmem:[%s3043_s28 + $0x128] sm:$0xff] %vm498_vm0, %v1541_v58  ;;  %v1325_v30 = vmul.f32 %v1836_v52, %v3790_v36  ;;  %v1162_v6 = vmul.f32 0.0052083335, %v1047_v49  ;;  %1843 = vrsqrt.f32 %v1208_v60  ;;  %v1161_v44 = vmul.f32 0.0052083335, %v3166_v20 }
 0x180   : > { %1636 = vst [vmem:[%s3043_s28 + $0x110] sm:$0xff] %v1538_v4  ;;  %1637 = vst.msk [vmem:[%s3043_s28 + $0x118] sm:$0xff] %vm498_vm0, %v1539_v34  ;;  %v1544_v29 = vadd.f32 %v3031_v13, %v1435_v46  ;;  %v1545_v41 = vadd.f32 %v3033_v40, %v1436_v16  ;;  %v1330_v50 = vmul.f32 %v1838_v35, %v3791_v8  ;;  %v1071_v56 = vpop.xlane.xlu1 %1070  ;;  %v1164_v57 = vmul.f32 0.0052083335, %v1055_v32  ;;  %v3793_v52 = vld [vmem:[#allocation6_spill] sm:$0xff]  ;;  %v3794_v58 = vld [vmem:[#allocation4_spill] sm:$0xff] }
 0x181   : > { %v1331_v12 = vmul.f32 %v1838_v35, %v3792_v62  ;;  %v1433_v47 = vmul.f32 %v3027_v38, %v1324_v54  ;;  %v1434_v25 = vmul.f32 %v3029_v9, %v1325_v30  ;;  %v1211_v31 = vadd.f32 1e-05, %v1162_v6  ;;  %v1067_v49 = vpop.xlane.xlu0 %1066  ;;  %v3795_v54 = vld [vmem:[#allocation13_spill] sm:$0xff]  ;;  %v3796_v30 = vld [vmem:[#allocation11_spill] sm:$0xff] }
 0x182   : > { %1642 = vst [vmem:[%s3043_s28 + $0x140] sm:$0xff] %v1544_v29  ;;  %1643 = vst.msk [vmem:[%s3043_s28 + $0x148] sm:$0xff] %vm498_vm0, %v1545_v41  ;;  %v1439_v11 = vmul.f32 %v3027_v38, %v1330_v50  ;;  %v1163_v1 = vmul.f32 0.0052083335, %v1051_v42  ;;  %v1210_v63 = vadd.f32 1e-05, %v1161_v44 }
 0x183   : > { %v1440_v24 = vmul.f32 %v3029_v9, %v1331_v12  ;;  %v1542_v18 = vadd.f32 %v3031_v13, %v1433_v47  ;;  %v1543_v37 = vadd.f32 %v3033_v40, %v1434_v25  ;;  %1845 = vrsqrt.f32 %v1211_v31  ;;  %v1840_v7 = vpop.eup %1839 }
 0x184   : > { %v1548_v19 = vadd.f32 %v3031_v13, %v1439_v11  ;;  %v1213_v5 = vadd.f32 1e-05, %v1164_v57  ;;  %v1212_v55 = vadd.f32 1e-05, %v1163_v1  ;;  %v1166_v20 = vmul.f32 0.0052083335, %v1063_v48  ;;  %v1079_v45 = vpop.xlane.xlu1 %1078 }
 0x185   : > { %v1549_v17 = vadd.f32 %v3033_v40, %v1440_v24  ;;  %1640 = vst [vmem:[%s3043_s28 + $0x130] sm:$0xff] %v1542_v18  ;;  %1641 = vst.msk [vmem:[%s3043_s28 + $0x138] sm:$0xff] %vm498_vm0, %v1543_v37  ;;  %v1165_v32 = vmul.f32 0.0052083335, %v1059_v53  ;;  %v1075_v61 = vpop.xlane.xlu0 %1074  ;;  %1847 = vrsqrt.f32 %v1210_v63  ;;  %v1168_v3 = vmul.f32 0.0052083335, %v1071_v56 }
 0x186   : > { %1646 = vst [vmem:[%s3043_s28 + $0x160] sm:$0xff] %v1548_v19  ;;  %v1167_v42 = vmul.f32 0.0052083335, %v1067_v49  ;;  %v1170_v26 = vmul.f32 0.0052083335, %v1079_v45  ;;  %1849 = vrsqrt.f32 %v1213_v5  ;;  %v1328_v43 = vmul.f32 %v1840_v7, %v3793_v52  ;;  %v3797_v56 = vld [vmem:[#allocation10_spill] sm:$0xff] }
 0x187   : > { %1647 = vst.msk [vmem:[%s3043_s28 + $0x168] sm:$0xff] %vm498_vm0, %v1549_v17  ;;  %v1215_v14 = vadd.f32 1e-05, %v1166_v20  ;;  %v1214_v21 = vadd.f32 1e-05, %v1165_v32  ;;  %v1329_v60 = vmul.f32 %v1840_v7, %v3794_v58  ;;  %1851 = vrsqrt.f32 %v1212_v55  ;;  %v1842_v48 = vpop.eup %1841  ;;  %v3798_v11 = vld [vmem:[#allocation8_spill] sm:$0xff] }
 0x188   : > { %v1169_v51 = vmul.f32 0.0052083335, %v1075_v61  ;;  %v1217_v53 = vadd.f32 1e-05, %v1168_v3  ;;  %v1216_v4 = vadd.f32 1e-05, %v1167_v42  ;;  %v1087_v46 = vpop.xlane.xlu1 %1086  ;;  %v1437_v35 = vmul.f32 %v3027_v38, %v1328_v43 }
 0x189   : > { %1853 = vrsqrt.f32 %v1215_v14  ;;  %v1219_v34 = vadd.f32 1e-05, %v1170_v26  ;;  %v1083_v16 = vpop.xlane.xlu0 %1082  ;;  %v1438_v22 = vmul.f32 %v3029_v9, %v1329_v60  ;;  %v1334_v36 = vmul.f32 %v1842_v48, %v3795_v54  ;;  %v1844_v29 = vpop.eup %1843  ;;  %v3799_v19 = vld [vmem:[#allocation17_spill] sm:$0xff]  ;;  %v3800_v63 = vld [vmem:[#allocation15_spill] sm:$0xff]  ;;  %v3802_v52 = vld [vmem:[#allocation12_spill] sm:$0xff] }
 0x18a   : > { %v1335_v6 = vmul.f32 %v1842_v48, %v3796_v30  ;;  %1855 = vrsqrt.f32 %v1214_v21  ;;  %v3248_v41 = vadd.f32 1e-05, %v1169_v51  ;;  %v1172_v8 = vmul.f32 0.0052083335, %v1087_v46  ;;  %v3801_v21 = vld [vmem:[#allocation14_spill] sm:$0xff] }
 0x18b   : > { %v1171_v50 = vmul.f32 0.0052083335, %v1083_v16  ;;  %v1546_v62 = vadd.f32 %v3031_v13, %v1437_v35  ;;  %v1547_v12 = vadd.f32 %v3033_v40, %v1438_v22  ;;  %v1443_v47 = vmul.f32 %v3027_v38, %v1334_v36  ;;  %v3804_v16 = vld [vmem:[#allocation19_spill] sm:$0xff]  ;;  %v3805_v30 = vld [vmem:[#allocation18_spill] sm:$0xff] }
 0x18c   : > { %v1444_v25 = vmul.f32 %v3029_v9, %v1335_v6  ;;  %v1332_v49 = vmul.f32 %v1844_v29, %v3797_v56  ;;  %v1333_v24 = vmul.f32 %v1844_v29, %v3798_v11  ;;  %1857 = vrsqrt.f32 %v1217_v53  ;;  %v1095_v57 = vpop.xlane.xlu1 %1094  ;;  %v3806_v29 = vld [vmem:[#allocation16_spill] sm:$0xff] }
 0x18d   : > { %v1846_v31 = vpop.eup %1845  ;;  %v3256_v44 = vadd.f32 1e-05, %v1172_v8  ;;  %v3258_v18 = vpop.xlane.xlu0 %1090  ;;  %1644 = vst [vmem:[%s3043_s28 + $0x150] sm:$0xff] %v1546_v62  ;;  %1645 = vst.msk [vmem:[%s3043_s28 + $0x158] sm:$0xff] %vm498_vm0, %v1547_v12  ;;  %v1552_v37 = vadd.f32 %v3031_v13, %v1443_v47  ;;  %1859 = vrsqrt.f32 %v1216_v4  ;;  %v3269_v32 = vadd.f32 1e-05, %v1171_v50 }
 0x18e   : > { %v1553_v1 = vadd.f32 %v3033_v40, %v1444_v25  ;;  %v1338_v17 = vmul.f32 %v1846_v31, %v3799_v19  ;;  %v1339_v5 = vmul.f32 %v1846_v31, %v3800_v63  ;;  %v1441_v55 = vmul.f32 %v3027_v38, %v1332_v49  ;;  %v3807_v12 = vld [vmem:[#allocation25_spill] sm:$0xff]  ;;  %v3808_v25 = vld [vmem:[#allocation23_spill] sm:$0xff] }
 0x18f   : > { %v1442_v20 = vmul.f32 %v3029_v9, %v1333_v24  ;;  %v1848_v45 = vpop.eup %1847  ;;  %1650 = vst [vmem:[%s3043_s28 + $0x180] sm:$0xff] %v1552_v37  ;;  %1861 = vrsqrt.f32 %v1219_v34  ;;  %v1174_v42 = vmul.f32 0.0052083335, %v1095_v57  ;;  %v3803_v34 = vld [vmem:[#allocation21_spill] sm:$0xff] }
 0x190   : > { %1651 = vst.msk [vmem:[%s3043_s28 + $0x188] sm:$0xff] %vm498_vm0, %v1553_v1  ;;  %v1447_v61 = vmul.f32 %v3027_v38, %v1338_v17  ;;  %v1448_v3 = vmul.f32 %v3029_v9, %v1339_v5  ;;  %v1850_v26 = vpop.eup %1849  ;;  %v1550_v7 = vadd.f32 %v3031_v13, %v1441_v55  ;;  %v1336_v51 = vmul.f32 %v1848_v45, %v3801_v21  ;;  %v3280_v58 = vpop.xlane.xlu1 %1102 }
 0x191   : > { %v1551_v14 = vadd.f32 %v3033_v40, %v1442_v20  ;;  %v1337_v43 = vmul.f32 %v1848_v45, %v3802_v52  ;;  %v3282_v60 = vpop.xlane.xlu0 %1098  ;;  %v1852_v48 = vpop.eup %1851  ;;  %v1342_v46 = vmul.f32 %v1850_v26, %v3803_v34  ;;  %v1343_v35 = vmul.f32 %v1850_v26, %v3804_v16  ;;  %v3810_v26 = vld [vmem:[#allocation20_spill] sm:$0xff] }
 0x192   : > { %v1556_v53 = vadd.f32 %v3031_v13, %v1447_v61  ;;  %v1557_v4 = vadd.f32 %v3033_v40, %v1448_v3  ;;  %1648 = vst [vmem:[%s3043_s28 + $0x170] sm:$0xff] %v1550_v7  ;;  %v1445_v54 = vmul.f32 %v3027_v38, %v1336_v51  ;;  %v1340_v6 = vmul.f32 %v1852_v48, %v3805_v30  ;;  %v3809_v61 = vld [vmem:[#allocation22_spill] sm:$0xff]  ;;  %v3811_v51 = vld [vmem:[#allocation29_spill] sm:$0xff] }
 0x193   : > { %v1854_v22 = vpop.eup %1853  ;;  %1649 = vst.msk [vmem:[%s3043_s28 + $0x178] sm:$0xff] %vm498_vm0, %v1551_v14  ;;  %v1446_v36 = vmul.f32 %v3029_v9, %v1337_v43  ;;  %v1341_v8 = vmul.f32 %v1852_v48, %v3806_v29  ;;  %v1451_v50 = vmul.f32 %v3027_v38, %v1342_v46  ;;  %v1452_v62 = vmul.f32 %v3029_v9, %v1343_v35  ;;  %v3812_v43 = vld [vmem:[#allocation27_spill] sm:$0xff]  ;;  %v3813_v30 = vld [vmem:[#allocation26_spill] sm:$0xff]  ;;  %v3814_v29 = vld [vmem:[#allocation24_spill] sm:$0xff] }
 0x194   : > { %1654 = vst [vmem:[%s3043_s28 + $0x1a0] sm:$0xff] %v1556_v53  ;;  %1655 = vst.msk [vmem:[%s3043_s28 + $0x1a8] sm:$0xff] %vm498_vm0, %v1557_v4  ;;  %v1346_v47 = vmul.f32 %v1854_v22, %v3807_v12  ;;  %v1347_v31 = vmul.f32 %v1854_v22, %v3808_v25  ;;  %v1856_v56 = vpop.eup %1855  ;;  %v1554_v49 = vadd.f32 %v3031_v13, %v1445_v54  ;;  %v3306_v37 = vpop.xlane.xlu1 %1110  ;;  %1863 = vrsqrt.f32 %v3248_v41  ;;  %v3816_v12 = vld [vmem:[#allocation31_spill] sm:$0xff] }
 0x195   : > { %v1555_v11 = vadd.f32 %v3033_v40, %v1446_v36  ;;  %v1449_v24 = vmul.f32 %v3027_v38, %v1340_v6  ;;  %v1450_v57 = vmul.f32 %v3029_v9, %v1341_v8  ;;  %v3308_v1 = vpop.xlane.xlu0 %1106  ;;  %v1560_v19 = vadd.f32 %v3031_v13, %v1451_v50  ;;  %v3815_v50 = vld [vmem:[#allocation33_spill] sm:$0xff] }
 0x196   : > { %v1561_v17 = vadd.f32 %v3033_v40, %v1452_v62  ;;  %v1455_v63 = vmul.f32 %v3027_v38, %v1346_v47  ;;  %v1456_v5 = vmul.f32 %v3029_v9, %v1347_v31  ;;  %v1858_v55 = vpop.eup %1857  ;;  %1652 = vst [vmem:[%s3043_s28 + $0x190] sm:$0xff] %v1554_v49  ;;  %v1344_v3 = vmul.f32 %v1856_v56, %v3809_v61 }
 0x197   : > { %1653 = vst.msk [vmem:[%s3043_s28 + $0x198] sm:$0xff] %vm498_vm0, %v1555_v11  ;;  %v1558_v20 = vadd.f32 %v3031_v13, %v1449_v24  ;;  %v1559_v45 = vadd.f32 %v3033_v40, %v1450_v57  ;;  %v1345_v7 = vmul.f32 %v1856_v56, %v3810_v26  ;;  %1658 = vst [vmem:[%s3043_s28 + $0x1c0] sm:$0xff] %v1560_v19  ;;  %v1860_v53 = vpop.eup %1859  ;;  %v1223_v46 = vadd.f32 1e-05, %v1174_v42 }
 0x198   : > { %1659 = vst.msk [vmem:[%s3043_s28 + $0x1c8] sm:$0xff] %vm498_vm0, %v1561_v17  ;;  %v1564_v14 = vadd.f32 %v3031_v13, %v1455_v63  ;;  %v1565_v21 = vadd.f32 %v3033_v40, %v1456_v5  ;;  %v1350_v52 = vmul.f32 %v1858_v55, %v3811_v51  ;;  %v1351_v48 = vmul.f32 %v1858_v55, %v3812_v43  ;;  %v1119_v16 = vpop.xlane.xlu1 %1118 }
 0x199   : > { %1656 = vst [vmem:[%s3043_s28 + $0x1b0] sm:$0xff] %v1558_v20  ;;  %1657 = vst.msk [vmem:[%s3043_s28 + $0x1b8] sm:$0xff] %vm498_vm0, %v1559_v45  ;;  %v1453_v4 = vmul.f32 %v3027_v38, %v1344_v3  ;;  %v1454_v34 = vmul.f32 %v3029_v9, %v1345_v7  ;;  %v1115_v35 = vpop.xlane.xlu0 %1114  ;;  %v1862_v22 = vpop.eup %1861  ;;  %v1348_v6 = vmul.f32 %v1860_v53, %v3813_v30  ;;  %1865 = vrsqrt.f32 %v3256_v44 }
 0x19a   : > { %1662 = vst [vmem:[%s3043_s28 + $0x1e0] sm:$0xff] %v1564_v14  ;;  %1663 = vst.msk [vmem:[%s3043_s28 + $0x1e8] sm:$0xff] %vm498_vm0, %v1565_v21  ;;  %v1459_v54 = vmul.f32 %v3027_v38, %v1350_v52  ;;  %v1460_v36 = vmul.f32 %v3029_v9, %v1351_v48  ;;  %v1349_v8 = vmul.f32 %v1860_v53, %v3814_v29  ;;  %v1173_v57 = vmul.f32 0.0052083335, %v3258_v18  ;;  %v3817_v53 = vld [vmem:[#allocation30_spill] sm:$0xff] }
 0x19b   : > { %v1562_v41 = vadd.f32 %v3031_v13, %v1453_v4  ;;  %v1563_v42 = vadd.f32 %v3033_v40, %v1454_v34  ;;  %v1354_v62 = vmul.f32 %v1862_v22, %v3815_v50  ;;  %v1355_v47 = vmul.f32 %v1862_v22, %v3816_v12  ;;  %v3818_v4 = vld [vmem:[#allocation28_spill] sm:$0xff] }
 0x19c   : > { %v1568_v25 = vadd.f32 %v3031_v13, %v1459_v54  ;;  %v1569_v31 = vadd.f32 %v3033_v40, %v1460_v36  ;;  %v1457_v56 = vmul.f32 %v3027_v38, %v1348_v6  ;;  %v1458_v49 = vmul.f32 %v3029_v9, %v1349_v8  ;;  %v1127_v19 = vpop.xlane.xlu1 %1126 }
 0x19d   : > { %1660 = vst [vmem:[%s3043_s28 + $0x1d0] sm:$0xff] %v1562_v41  ;;  %1661 = vst.msk [vmem:[%s3043_s28 + $0x1d8] sm:$0xff] %vm498_vm0, %v1563_v42  ;;  %v1463_v11 = vmul.f32 %v3027_v38, %v1354_v62  ;;  %v1464_v24 = vmul.f32 %v3029_v9, %v1355_v47  ;;  %1867 = vrsqrt.f32 %v3269_v32  ;;  %v1176_v5 = vmul.f32 0.0052083335, %v3280_v58  ;;  %v1123_v55 = vpop.xlane.xlu0 %1122  ;;  %v3819_v42 = vld [vmem:[#allocation37_spill] sm:$0xff]  ;;  %v3820_v62 = vld [vmem:[#allocation35_spill] sm:$0xff] }
 0x19e   : > { %1666 = vst [vmem:[%s3043_s28 + $0x200] sm:$0xff] %v1568_v25  ;;  %1667 = vst.msk [vmem:[%s3043_s28 + $0x208] sm:$0xff] %vm498_vm0, %v1569_v31  ;;  %v1566_v17 = vadd.f32 %v3031_v13, %v1457_v56  ;;  %v1567_v63 = vadd.f32 %v3033_v40, %v1458_v49  ;;  %1869 = vrsqrt.f32 %v1223_v46  ;;  %v1222_v18 = vadd.f32 1e-05, %v1173_v57  ;;  %v1864_v51 = vpop.eup %1863  ;;  %v3821_v25 = vld [vmem:[#allocation34_spill] sm:$0xff]  ;;  %v3822_v56 = vld [vmem:[#allocation32_spill] sm:$0xff] }
 0x19f   : > { %v1572_v20 = vadd.f32 %v3031_v13, %v1463_v11  ;;  %v1573_v44 = vadd.f32 %v3033_v40, %v1464_v24  ;;  %v1225_v45 = vadd.f32 1e-05, %v1176_v5  ;;  %v1175_v61 = vmul.f32 0.0052083335, %v3282_v60 }
 0x1a0   : > { %1664 = vst [vmem:[%s3043_s28 + $0x1f0] sm:$0xff] %v1566_v17  ;;  %1665 = vst.msk [vmem:[%s3043_s28 + $0x1f8] sm:$0xff] %vm498_vm0, %v1567_v63  ;;  %v1178_v3 = vmul.f32 0.0052083335, %v3306_v37  ;;  %1871 = vrsqrt.f32 %v1222_v18  ;;  %v1177_v32 = vmul.f32 0.0052083335, %v3308_v1  ;;  %v1135_v21 = vpop.xlane.xlu1 %1134  ;;  %v1352_v60 = vmul.f32 %v1864_v51, %v3817_v53 }
 0x1a1   : > { %1670 = vst [vmem:[%s3043_s28 + $0x220] sm:$0xff] %v1572_v20  ;;  %1671 = vst.msk [vmem:[%s3043_s28 + $0x228] sm:$0xff] %vm498_vm0, %v1573_v44  ;;  %v1180_v58 = vmul.f32 0.0052083335, %v1119_v16  ;;  %v1179_v26 = vmul.f32 0.0052083335, %v1115_v35  ;;  %1873 = vrsqrt.f32 %v1225_v45  ;;  %v1353_v37 = vmul.f32 %v1864_v51, %v3818_v4  ;;  %v1131_v34 = vpop.xlane.xlu0 %1130 }
 0x1a2   : > { %v1224_v7 = vadd.f32 1e-05, %v1175_v61  ;;  %v1227_v14 = vadd.f32 1e-05, %v1178_v3  ;;  %v1226_v52 = vadd.f32 1e-05, %v1177_v32  ;;  %v1461_v16 = vmul.f32 %v3027_v38, %v1352_v60 }
 0x1a3   : > { %v1229_v43 = vadd.f32 1e-05, %v1180_v58  ;;  %v1182_v48 = vmul.f32 0.0052083335, %v1127_v19  ;;  %v1228_v46 = vadd.f32 1e-05, %v1179_v26  ;;  %v1462_v35 = vmul.f32 %v3029_v9, %v1353_v37  ;;  %v1866_v54 = vpop.eup %1865 }
 0x1a4   : > { %1875 = vrsqrt.f32 %v1224_v7  ;;  %v1181_v22 = vmul.f32 0.0052083335, %v1123_v55  ;;  %v1184_v1 = vmul.f32 0.0052083335, %v1135_v21  ;;  %v1183_v6 = vmul.f32 0.0052083335, %v1131_v34 }
 0x1a5   : > { %1877 = vrsqrt.f32 %v1227_v14  ;;  %v1231_v36 = vadd.f32 1e-05, %v1182_v48  ;;  %v1570_v8 = vadd.f32 %v3031_v13, %v1461_v16  ;;  %v1571_v41 = vadd.f32 %v3033_v40, %v1462_v35  ;;  %v3823_v19 = vld [vmem:[#allocation41_spill] sm:$0xff]  ;;  %v3824_v63 = vld [vmem:[#allocation39_spill] sm:$0xff]  ;;  %v3825_v14 = vld [vmem:[#allocation38_spill] sm:$0xff] }
 0x1a6   : > { %1879 = vrsqrt.f32 %v1226_v52  ;;  %v3378_v30 = vadd.f32 1e-05, %v1181_v22  ;;  %v1358_v50 = vmul.f32 %v1866_v54, %v3819_v42  ;;  %v1359_v12 = vmul.f32 %v1866_v54, %v3820_v62  ;;  %v3826_v51 = vld [vmem:[#allocation36_spill] sm:$0xff]  ;;  %v3827_v4 = vld [vmem:[#allocation45_spill] sm:$0xff] }
 0x1a7   : > { %1881 = vrsqrt.f32 %v1229_v43  ;;  %v1868_v29 = vpop.eup %1867  ;;  %v3386_v11 = vadd.f32 1e-05, %v1184_v1  ;;  %1668 = vst [vmem:[%s3043_s28 + $0x210] sm:$0xff] %v1570_v8  ;;  %1669 = vst.msk [vmem:[%s3043_s28 + $0x218] sm:$0xff] %vm498_vm0, %v1571_v41  ;;  %v3397_v18 = vadd.f32 1e-05, %v1183_v6 }
 0x1a8   : > { %v1870_v47 = vpop.eup %1869  ;;  %v1356_v31 = vmul.f32 %v1868_v29, %v3821_v25  ;;  %v1357_v49 = vmul.f32 %v1868_v29, %v3822_v56  ;;  %1883 = vrsqrt.f32 %v1228_v46  ;;  %v1467_v24 = vmul.f32 %v3027_v38, %v1358_v50  ;;  %v3828_v1 = vld [vmem:[#allocation42_spill] sm:$0xff]  ;;  %v3829_v35 = vld [vmem:[#allocation40_spill] sm:$0xff] }
 0x1a9   : > { %v1468_v57 = vmul.f32 %v3029_v9, %v1359_v12  ;;  %v1362_v17 = vmul.f32 %v1870_v47, %v3823_v19  ;;  %v1363_v5 = vmul.f32 %v1870_v47, %v3824_v63  ;;  %1885 = vrsqrt.f32 %v1231_v36  ;;  %v3831_v19 = vld [vmem:[#allocation46_spill] sm:$0xff] }
 0x1aa   : > { %v1872_v55 = vpop.eup %1871  ;;  %v1465_v20 = vmul.f32 %v3027_v38, %v1356_v31  ;;  %v1466_v44 = vmul.f32 %v3029_v9, %v1357_v49  ;;  %v1576_v61 = vadd.f32 %v3031_v13, %v1467_v24  ;;  %v3830_v24 = vld [vmem:[#allocation43_spill] sm:$0xff]  ;;  %1887 = vrsqrt.f32 %v3378_v30 }
 0x1ab   : > { %v1874_v45 = vpop.eup %1873  ;;  %v1577_v3 = vadd.f32 %v3033_v40, %v1468_v57  ;;  %v1471_v32 = vmul.f32 %v3027_v38, %v1362_v17  ;;  %v1472_v58 = vmul.f32 %v3029_v9, %v1363_v5  ;;  %v1360_v21 = vmul.f32 %v1872_v55, %v3825_v14 }
 0x1ac   : > { %v1574_v26 = vadd.f32 %v3031_v13, %v1465_v20  ;;  %v1575_v7 = vadd.f32 %v3033_v40, %v1466_v44  ;;  %v1361_v52 = vmul.f32 %v1872_v55, %v3826_v51  ;;  %1674 = vst [vmem:[%s3043_s28 + $0x240] sm:$0xff] %v1576_v61  ;;  %v1366_v60 = vmul.f32 %v1874_v45, %v2921_v2 }
 0x1ad   : > { %1675 = vst.msk [vmem:[%s3043_s28 + $0x248] sm:$0xff] %vm498_vm0, %v1577_v3  ;;  %v1580_v48 = vadd.f32 %v3031_v13, %v1471_v32  ;;  %v1581_v53 = vadd.f32 %v3033_v40, %v1472_v58  ;;  %v1367_v37 = vmul.f32 %v1874_v45, %v3827_v4  ;;  %v1469_v46 = vmul.f32 %v3027_v38, %v1360_v21  ;;  %v3832_v3 = vld [vmem:[#allocation44_spill] sm:$0xff]  ;;  %v3833_v58 = vld [vmem:[#allocation47_spill] sm:$0xff] }
 0x1ae   : > { %v1876_v43 = vpop.eup %1875  ;;  %1672 = vst [vmem:[%s3043_s28 + $0x230] sm:$0xff] %v1574_v26  ;;  %1673 = vst.msk [vmem:[%s3043_s28 + $0x238] sm:$0xff] %vm498_vm0, %v1575_v7  ;;  %v1470_v22 = vmul.f32 %v3029_v9, %v1361_v52  ;;  %v1475_v2 = vmul.f32 %v3027_v38, %v1366_v60  ;;  %1889 = vrsqrt.f32 %v3386_v11  ;;  %v3834_v11 = vld [vmem:[#allocation50_spill] sm:$0xff] }
 0x1af   : > { %v1878_v34 = vpop.eup %1877  ;;  %v1364_v16 = vmul.f32 %v1876_v43, %v3828_v1  ;;  %v1365_v54 = vmul.f32 %v1876_v43, %v3829_v35  ;;  %1678 = vst [vmem:[%s3043_s28 + $0x260] sm:$0xff] %v1580_v48  ;;  %1679 = vst.msk [vmem:[%s3043_s28 + $0x268] sm:$0xff] %vm498_vm0, %v1581_v53  ;;  %v1476_v6 = vmul.f32 %v3029_v9, %v1367_v37  ;;  %1891 = vrsqrt.f32 %v3397_v18 }
 0x1b0   : > { %v1880_v36 = vpop.eup %1879  ;;  %v1370_v29 = vmul.f32 %v1878_v34, %v2943_v39  ;;  %v1371_v8 = vmul.f32 %v1878_v34, %v2946_v27  ;;  %v1578_v42 = vadd.f32 %v3031_v13, %v1469_v46  ;;  %v1579_v50 = vadd.f32 %v3033_v40, %v1470_v22 }
 0x1b1   : > { %v1882_v41 = vpop.eup %1881  ;;  %v1473_v62 = vmul.f32 %v3027_v38, %v1364_v16  ;;  %v1474_v12 = vmul.f32 %v3029_v9, %v1365_v54  ;;  %v1584_v47 = vadd.f32 %v3031_v13, %v1475_v2  ;;  %v1585_v25 = vadd.f32 %v3033_v40, %v1476_v6  ;;  %v3835_v2 = vld [vmem:[#allocation49_spill] sm:$0xff] }
 0x1b2   : > { %v1479_v31 = vmul.f32 %v3027_v38, %v1370_v29  ;;  %v1480_v39 = vmul.f32 %v3029_v9, %v1371_v8  ;;  %v1884_v27 = vpop.eup %1883  ;;  %1676 = vst [vmem:[%s3043_s28 + $0x250] sm:$0xff] %v1578_v42  ;;  %1677 = vst.msk [vmem:[%s3043_s28 + $0x258] sm:$0xff] %vm498_vm0, %v1579_v50  ;;  %v1368_v57 = vmul.f32 %v1880_v36, %v3830_v24  ;;  %v3836_v29 = vld [vmem:[#allocation48_spill] sm:$0xff] }
 0x1b3   : > { %v1582_v56 = vadd.f32 %v3031_v13, %v1473_v62  ;;  %v1583_v49 = vadd.f32 %v3033_v40, %v1474_v12  ;;  %v1369_v17 = vmul.f32 %v1880_v36, %v3831_v19  ;;  %1682 = vst [vmem:[%s3043_s28 + $0x280] sm:$0xff] %v1584_v47  ;;  %1683 = vst.msk [vmem:[%s3043_s28 + $0x288] sm:$0xff] %vm498_vm0, %v1585_v25  ;;  %v1886_v44 = vpop.eup %1885 }
 0x1b4   : > { %v1588_v63 = vadd.f32 %v3031_v13, %v1479_v31  ;;  %v1589_v5 = vadd.f32 %v3033_v40, %v1480_v39  ;;  %v1374_v55 = vmul.f32 %v1882_v41, %v2965_v59  ;;  %v1375_v20 = vmul.f32 %v1882_v41, %v2968_v15  ;;  %v1888_v46 = vpop.eup %1887 }
 0x1b5   : > { %1680 = vst [vmem:[%s3043_s28 + $0x270] sm:$0xff] %v1582_v56  ;;  %1681 = vst.msk [vmem:[%s3043_s28 + $0x278] sm:$0xff] %vm498_vm0, %v1583_v49  ;;  %v1477_v45 = vmul.f32 %v3027_v38, %v1368_v57  ;;  %v1478_v61 = vmul.f32 %v3029_v9, %v1369_v17  ;;  %v1372_v32 = vmul.f32 %v1884_v27, %v3832_v3 }
 0x1b6   : > { %v1373_v26 = vmul.f32 %v1884_v27, %v3833_v58  ;;  %1686 = vst [vmem:[%s3043_s28 + $0x2a0] sm:$0xff] %v1588_v63  ;;  %1687 = vst.msk [vmem:[%s3043_s28 + $0x2a8] sm:$0xff] %vm498_vm0, %v1589_v5  ;;  %v1483_v59 = vmul.f32 %v3027_v38, %v1374_v55  ;;  %v1484_v15 = vmul.f32 %v3029_v9, %v1375_v20 }
 0x1b7   : > { %v1378_v7 = vmul.f32 %v1886_v44, %v2987_v28  ;;  %v1379_v14 = vmul.f32 %v1886_v44, %v2990_v33  ;;  %v1586_v21 = vadd.f32 %v3031_v13, %v1477_v45  ;;  %v1587_v51 = vadd.f32 %v3033_v40, %v1478_v61 }
 0x1b8   : > { %v1481_v52 = vmul.f32 %v3027_v38, %v1372_v32  ;;  %v1482_v43 = vmul.f32 %v3029_v9, %v1373_v26  ;;  %v1592_v48 = vadd.f32 %v3031_v13, %v1483_v59  ;;  %v1593_v53 = vadd.f32 %v3033_v40, %v1484_v15  ;;  %v1890_v22 = vpop.eup %1889 }
 0x1b9   : > { %v1487_v28 = vmul.f32 %v3027_v38, %v1378_v7  ;;  %v1488_v33 = vmul.f32 %v3029_v9, %v1379_v14  ;;  %1684 = vst [vmem:[%s3043_s28 + $0x290] sm:$0xff] %v1586_v21  ;;  %1685 = vst.msk [vmem:[%s3043_s28 + $0x298] sm:$0xff] %vm498_vm0, %v1587_v51  ;;  %v1376_v30 = vmul.f32 %v1888_v46, %v2972_v23  ;;  %v1892_v16 = vpop.eup %1891 }
 0x1ba   : > { %v1590_v60 = vadd.f32 %v3031_v13, %v1481_v52  ;;  %v1591_v4 = vadd.f32 %v3033_v40, %v1482_v43  ;;  %1690 = vst [vmem:[%s3043_s28 + $0x2c0] sm:$0xff] %v1592_v48  ;;  %1691 = vst.msk [vmem:[%s3043_s28 + $0x2c8] sm:$0xff] %vm498_vm0, %v1593_v53  ;;  %v1377_v1 = vmul.f32 %v1888_v46, %v2975_v0 }
 0x1bb   : > { %v1596_v37 = vadd.f32 %v3031_v13, %v1487_v28  ;;  %v1597_v34 = vadd.f32 %v3033_v40, %v1488_v33  ;;  %v1382_v35 = vmul.f32 %v1890_v22, %v3009_v10  ;;  %v1383_v54 = vmul.f32 %v1890_v22, %v3834_v11 }
 0x1bc   : > { %1688 = vst [vmem:[%s3043_s28 + $0x2b0] sm:$0xff] %v1590_v60  ;;  %1689 = vst.msk [vmem:[%s3043_s28 + $0x2b8] sm:$0xff] %vm498_vm0, %v1591_v4  ;;  %v1485_v36 = vmul.f32 %v3027_v38, %v1376_v30  ;;  %v1486_v18 = vmul.f32 %v3029_v9, %v1377_v1  ;;  %v1380_v6 = vmul.f32 %v1892_v16, %v3835_v2 }
 0x1bd   : > { %1694 = vst [vmem:[%s3043_s28 + $0x2e0] sm:$0xff] %v1596_v37  ;;  %1695 = vst.msk [vmem:[%s3043_s28 + $0x2e8] sm:$0xff] %vm498_vm0, %v1597_v34  ;;  %v1381_v23 = vmul.f32 %v1892_v16, %v3836_v29  ;;  %v1491_v0 = vmul.f32 %v3027_v38, %v1382_v35  ;;  %v1492_v8 = vmul.f32 %v3029_v9, %v1383_v54 }
 0x1be   : > { %v1594_v10 = vadd.f32 %v3031_v13, %v1485_v36  ;;  %v1595_v41 = vadd.f32 %v3033_v40, %v1486_v18  ;;  %v1489_v42 = vmul.f32 %v3027_v38, %v1380_v6 }
 0x1bf   : > { %v1490_v50 = vmul.f32 %v3029_v9, %v1381_v23  ;;  %v1600_v62 = vadd.f32 %v3031_v13, %v1491_v0  ;;  %v1601_v12 = vadd.f32 %v3033_v40, %v1492_v8 }
 0x1c0   : > { %1692 = vst [vmem:[%s3043_s28 + $0x2d0] sm:$0xff] %v1594_v10  ;;  %1693 = vst.msk [vmem:[%s3043_s28 + $0x2d8] sm:$0xff] %vm498_vm0, %v1595_v41  ;;  %v1598_v47 = vadd.f32 %v3031_v13, %v1489_v42 }
 0x1c1   : > { %v1599_v25 = vadd.f32 %v3033_v40, %v1490_v50  ;;  %1698 = vst [vmem:[%s3043_s28 + $0x300] sm:$0xff] %v1600_v62  ;;  %1699 = vst.msk [vmem:[%s3043_s28 + $0x308] sm:$0xff] %vm498_vm0, %v1601_v12 }
 0x1c2   : > { %1696 = vst [vmem:[%s3043_s28 + $0x2f0] sm:$0xff] %v1598_v47 }
 0x1c3   : > { %1697 = vst.msk [vmem:[%s3043_s28 + $0x2f8] sm:$0xff] %vm498_vm0, %v1599_v25 }
 0x1c4 PF: > { %s13_s12 = sadd.s32 1, %s1899_s12  }
 0x1c5   : > { %p10_p4 = scmp.ge.s32.totalorder %s13_s12, 4  }
 0x1c7   :  { %12 = sbr.rel (!%p10_p4) target bundleno = 1 (0x1), region = 66 }

</bundles_post_ra>
